<compile_context>
chip_gen: v5e
topology: v5e:2x2
jax: 0.10.0
libtpu: 0.0.40
codegen_flags: <defaults>
</compile_context>

<pallas_src>
import numpy as np
import jax
import jax.numpy as jnp
from jax.experimental import pallas as pl
from jax.experimental.pallas import tpu as pltpu

# ------------------------- problem sizes -------------------------
N_ACTIONS = 81
C_IN = 81            # state_shape[0] -> Conv1d in_channels
C1, C2 = 16, 32      # conv output channels
K = 3                # kernel size
L_IN = 12            # input length (32 * (L_IN - 4) == 256)
L1 = L_IN - (K - 1)  # 10
L2 = L1 - (K - 1)    # 8
F_IN = C_IN * L_IN   # 972   flattened input features (i*L_IN + t)
F1 = C1 * L1         # 160   conv1 output features (o*L1 + l)
F1_PAD = 256         # lane-aligned conv1 feature dim (zero-padded)
F2 = C2 * L2         # 256   conv2 output features == torch Flatten order
F_HID = 128
OUT_PAD = 128        # lane-dense padded action dim (>= N_ACTIONS)

DEFAULT_TILE_B = 1024  # per-grid-step batch tile (multiple of 16)


def _round_up(x, m):
    return (x + m - 1) // m * m


# ------------------------- Pallas kernel -------------------------
def dqn_kernel(x_ref, w1_ref, b1_ref, w2_ref, b2_ref, w34_ref, b34_ref, out_ref):
    # x_ref  : (TB, F_IN)        f32 flattened NCL input (cast to bf16 here)
    # w1_ref : (F_IN, F1_PAD)    bf16 block-Toeplitz conv1 (cols >= F1 are zero)
    # w2_ref : (F1_PAD, F2)      bf16 block-Toeplitz conv2 (rows >= F1 are zero)
    # w34_ref: (F2, OUT_PAD)     bf16 fused fc1@fc2 (cols >= N_ACTIONS are zero)
    # biases : (1, Fout)         f32 (broadcast over batch)
    # out    : (TB, OUT_PAD)     f32
    x = x_ref[...].astype(jnp.bfloat16)   # in-kernel cast: HBM carries f32 once

    h1 = jnp.dot(x, w1_ref[...], preferred_element_type=jnp.float32) + b1_ref[...]
    h1 = jnp.maximum(h1, 0.0).astype(jnp.bfloat16)

    h2 = jnp.dot(h1, w2_ref[...], preferred_element_type=jnp.float32) + b2_ref[...]
    h2 = jnp.maximum(h2, 0.0).astype(jnp.bfloat16)

    out_ref[...] = (jnp.dot(h2, w34_ref[...], preferred_element_type=jnp.float32)
                    + b34_ref[...])


# ------------------------- parameter packing (one-time layout glue) ----------
def pack_params(params, dtype=jnp.bfloat16):
    """Fold convs into block-Toeplitz matmuls, fuse fc1/fc2, lane-pad features."""
    w1 = np.asarray(params["w1"], np.float32)   # (C1, C_IN, K)  torch Conv1d layout
    w2 = np.asarray(params["w2"], np.float32)   # (C2, C1, K)
    w3 = np.asarray(params["w3"], np.float32)   # (F_HID, F2)    torch Linear layout
    w4 = np.asarray(params["w4"], np.float32)   # (N_ACTIONS, F_HID)
    b1 = np.asarray(params["b1"], np.float32)
    b2 = np.asarray(params["b2"], np.float32)
    b3 = np.asarray(params["b3"], np.float32)
    b4 = np.asarray(params["b4"], np.float32)

    # Conv1 as dense matmul: W1[i*L_IN + t, o*L1 + l] = w1[o, i, t - l].
    W1 = np.zeros((C_IN, L_IN, C1, L1), np.float32)
    for l in range(L1):
        for k in range(K):
            W1[:, l + k, :, l] = w1[:, :, k].T
    W1 = W1.reshape(F_IN, F1)
    W1p = np.zeros((F_IN, F1_PAD), np.float32)
    W1p[:, :F1] = W1
    B1p = np.zeros((1, F1_PAD), np.float32)
    B1p[0, :F1] = np.repeat(b1, L1)                        # per-channel bias over L1

    # Conv2 as dense matmul: W2[c*L1 + t, o*L2 + l] = w2[o, c, t - l].
    # Output index o*L2 + l is exactly torch's channel-major Flatten order.
    W2 = np.zeros((C1, L1, C2, L2), np.float32)
    for l in range(L2):
        for k in range(K):
            W2[:, l + k, :, l] = w2[:, :, k].T
    W2 = W2.reshape(F1, F2)
    W2p = np.zeros((F1_PAD, F2), np.float32)
    W2p[:F1, :] = W2                                        # padded h1 cols hit zero rows
    B2p = np.repeat(b2, L2)[None, :]                        # (1, F2)

    # fc1 and fc2 fold into one linear map (no ReLU between them):
    #   out = (flat @ w3.T + b3) @ w4.T + b4 = flat @ (w3.T @ w4.T) + (b3 @ w4.T + b4)
    W34 = w3.T @ w4.T                                       # (F2, N_ACTIONS), f32
    B34 = b3 @ w4.T + b4                                    # (N_ACTIONS,)
    W34p = np.zeros((F2, OUT_PAD), np.float32)
    W34p[:, :N_ACTIONS] = W34
    B34p = np.zeros((1, OUT_PAD), np.float32)
    B34p[0, :N_ACTIONS] = B34

    return {
        "w1": jnp.asarray(W1p, dtype),
        "b1": jnp.asarray(B1p, jnp.float32),
        "w2": jnp.asarray(W2p, dtype),
        "b2": jnp.asarray(B2p, jnp.float32),
        "w34": jnp.asarray(W34p, dtype),
        "b34": jnp.asarray(B34p, jnp.float32),
    }


# ------------------------- wrapper -------------------------
def dqn_forward(x_ncl, packed, tile_b=DEFAULT_TILE_B):
    """x_ncl: (B, 81, 12) float32 in PyTorch NCL layout. Returns (B, 81) q-values."""
    B = x_ncl.shape[0]
    x_flat = x_ncl.reshape(B, F_IN)         # free reshape; stays f32 (cast is in-kernel)

    b16 = _round_up(B, 16)
    tb = min(tile_b, b16)                   # batch tile: multiple of 16
    # v7x has two TensorCores: keep >= 2 "parallel" grid steps whenever B allows.
    if b16 >= 32 and pl.cdiv(B, tb) < 2:
        tb = _round_up((b16 + 1) // 2, 16)

    if B < tb:
        # Tiny batch: cheap row pad so the single block is fully in-bounds.
        x_flat = jnp.pad(x_flat, ((0, tb - B), (0, 0)))
    n_rows = x_flat.shape[0]
    grid_b = pl.cdiv(n_rows, tb)            # ragged last tile handled by masked edges

    const = lambda i: (0, 0)   # weights/biases stay VMEM-resident across the grid

    out = pl.pallas_call(
        dqn_kernel,
        out_shape=jax.ShapeDtypeStruct((n_rows, OUT_PAD), jnp.float32),
        grid_spec=pltpu.PrefetchScalarGridSpec(
            num_scalar_prefetch=0,
            grid=(grid_b,),
            in_specs=[
                pl.BlockSpec((tb, F_IN), lambda i: (i, 0)),
                pl.BlockSpec((F_IN, F1_PAD), const),
                pl.BlockSpec((1, F1_PAD), const),
                pl.BlockSpec((F1_PAD, F2), const),
                pl.BlockSpec((1, F2), const),
                pl.BlockSpec((F2, OUT_PAD), const),
                pl.BlockSpec((1, OUT_PAD), const),
            ],
            out_specs=pl.BlockSpec((tb, OUT_PAD), lambda i: (i, 0)),
        ),
        compiler_params=pltpu.CompilerParams(
            dimension_semantics=("parallel",),
            vmem_limit_bytes=64 * 1024 * 1024),
    )(x_flat, packed["w1"], packed["b1"], packed["w2"], packed["b2"],
      packed["w34"], packed["b34"])

    return out[:B, :N_ACTIONS]


# ------------------------- pure-JAX reference (f32, torch semantics) ---------
def dqn_reference(x_ncl, p):
    def conv1d(h, w, b):
        out = jax.lax.conv_general_dilated(
            h, w, window_strides=(1,), padding="VALID",
            dimension_numbers=("NCH", "OIH", "NCH"))
        return out + b[None, :, None]

    h = jax.nn.relu(conv1d(x_ncl, p["w1"], p["b1"]))
    h = jax.nn.relu(conv1d(h, p["w2"], p["b2"]))
    flat = h.reshape(h.shape[0], -1)                # (B, 256), channel-major like torch
    fc1 = flat @ p["w3"].T + p["b3"]                # NOTE: no ReLU here, per the spec
    return fc1 @ p["w4"].T + p["b4"]


# ------------------------- deterministic params -------------------------
def init_params(key):
    def uniform(key, shape, fan_in):
        bound = 1.0 / np.sqrt(fan_in)
        return jax.random.uniform(key, shape, jnp.float32, -bound, bound)

    ks = jax.random.split(key, 8)
    return {
        "w1": uniform(ks[0], (C1, C_IN, K), C_IN * K),     # torch Conv1d weight layout
        "b1": uniform(ks[1], (C1,), C_IN * K),
        "w2": uniform(ks[2], (C2, C1, K), C1 * K),
        "b2": uniform(ks[3], (C2,), C1 * K),
        "w3": uniform(ks[4], (F_HID, F2), F2),             # torch Linear weight layout
        "b3": uniform(ks[5], (F_HID,), F2),
        "w4": uniform(ks[6], (N_ACTIONS, F_HID), F_HID),
        "b4": uniform(ks[7], (N_ACTIONS,), F_HID),
    }


if __name__ == "__main__":
    key = jax.random.PRNGKey(0)
    pkey, xkey = jax.random.split(key)
    params = init_params(pkey)
    packed = pack_params(params)

    B = 16  # matches batch_size in the original script
    x = jax.random.normal(xkey, (B, C_IN, L_IN), jnp.float32)     # NCL, like torch Conv1d

    qvals = jax.block_until_ready(dqn_forward(x, packed))
    qref = jax.block_until_ready(dqn_reference(x, params))

    assert qvals.shape == (B, N_ACTIONS)
    # bf16 weights/activations with f32 accumulation -> loosened tolerance.
    np.testing.assert_allclose(np.asarray(qvals), np.asarray(qref), rtol=2e-2, atol=2e-2)
    print("KERNEL_OK")
</pallas_src>

<mosaic_0001>
module attributes {stable_mosaic.version = 11 : i64} {
  func.func @dqn_kernel(%arg0: i32, %arg1: memref<16x972xf32, #tpu.memory_space<vmem>>, %arg2: memref<972x256xbf16, #tpu.memory_space<vmem>>, %arg3: memref<1x256xf32, #tpu.memory_space<vmem>>, %arg4: memref<256x256xbf16, #tpu.memory_space<vmem>>, %arg5: memref<1x256xf32, #tpu.memory_space<vmem>>, %arg6: memref<256x128xbf16, #tpu.memory_space<vmem>>, %arg7: memref<1x128xf32, #tpu.memory_space<vmem>>, %arg8: memref<16x128xf32, #tpu.memory_space<vmem>>) attributes {dimension_semantics = [#tpu.dimension_semantics<parallel>], iteration_bounds = array<i64: 1>, scalar_prefetch = 0 : i64, scratch_operands = 0 : i64, tpu.core_type = #tpu.core_type<tc>, window_params = [{transform_indices = @transform_0, window_bounds = array<i64: 16, 972>}, {pipeline_mode = #tpu.pipeline_mode<synchronous>, transform_indices = @transform_1, window_bounds = array<i64: 972, 256>}, {pipeline_mode = #tpu.pipeline_mode<synchronous>, transform_indices = @transform_2, window_bounds = array<i64: 1, 256>}, {pipeline_mode = #tpu.pipeline_mode<synchronous>, transform_indices = @transform_3, window_bounds = array<i64: 256, 256>}, {pipeline_mode = #tpu.pipeline_mode<synchronous>, transform_indices = @transform_4, window_bounds = array<i64: 1, 256>}, {pipeline_mode = #tpu.pipeline_mode<synchronous>, transform_indices = @transform_5, window_bounds = array<i64: 256, 128>}, {pipeline_mode = #tpu.pipeline_mode<synchronous>, transform_indices = @transform_6, window_bounds = array<i64: 1, 128>}, {transform_indices = @transform_7, window_bounds = array<i64: 16, 128>}]} {
    %c0 = arith.constant 0 : index
    %c0_0 = arith.constant 0 : index
    %0 = vector.load %arg1[%c0, %c0_0] : memref<16x972xf32, #tpu.memory_space<vmem>>, vector<16x972xf32>
    %1 = arith.truncf %0 : vector<16x972xf32> to vector<16x972xbf16>
    %c0_1 = arith.constant 0 : index
    %c0_2 = arith.constant 0 : index
    %2 = vector.load %arg2[%c0_1, %c0_2] : memref<972x256xbf16, #tpu.memory_space<vmem>>, vector<972x256xbf16>
    %cst = arith.constant dense<0.000000e+00> : vector<16x256xf32>
    %3 = tpu.matmul %1, %2, %cst {dimension_numbers = #tpu.dot_dimension_numbers<[1], [0], [0], [1], [0, 0, 1, 1], [], []>} : vector<16x972xbf16>, vector<972x256xbf16>, vector<16x256xf32> -> vector<16x256xf32>
    %c0_3 = arith.constant 0 : index
    %c0_4 = arith.constant 0 : index
    %4 = vector.load %arg3[%c0_3, %c0_4] : memref<1x256xf32, #tpu.memory_space<vmem>>, vector<1x256xf32>
    %5 = vector.broadcast %4 : vector<1x256xf32> to vector<16x256xf32>
    %6 = arith.addf %3, %5 : vector<16x256xf32>
    %cst_5 = arith.constant 0.000000e+00 : f32
    %7 = vector.broadcast %cst_5 : f32 to vector<16x256xf32>
    %8 = arith.maximumf %6, %7 : vector<16x256xf32>
    %9 = arith.truncf %8 : vector<16x256xf32> to vector<16x256xbf16>
    %c0_6 = arith.constant 0 : index
    %c0_7 = arith.constant 0 : index
    %10 = vector.load %arg4[%c0_6, %c0_7] : memref<256x256xbf16, #tpu.memory_space<vmem>>, vector<256x256xbf16>
    %cst_8 = arith.constant dense<0.000000e+00> : vector<16x256xf32>
    %11 = tpu.matmul %9, %10, %cst_8 {dimension_numbers = #tpu.dot_dimension_numbers<[1], [0], [0], [1], [0, 0, 1, 1], [], []>} : vector<16x256xbf16>, vector<256x256xbf16>, vector<16x256xf32> -> vector<16x256xf32>
    %c0_9 = arith.constant 0 : index
    %c0_10 = arith.constant 0 : index
    %12 = vector.load %arg5[%c0_9, %c0_10] : memref<1x256xf32, #tpu.memory_space<vmem>>, vector<1x256xf32>
    %13 = vector.broadcast %12 : vector<1x256xf32> to vector<16x256xf32>
    %14 = arith.addf %11, %13 : vector<16x256xf32>
    %cst_11 = arith.constant 0.000000e+00 : f32
    %15 = vector.broadcast %cst_11 : f32 to vector<16x256xf32>
    %16 = arith.maximumf %14, %15 : vector<16x256xf32>
    %17 = arith.truncf %16 : vector<16x256xf32> to vector<16x256xbf16>
    %c0_12 = arith.constant 0 : index
    %c0_13 = arith.constant 0 : index
    %18 = vector.load %arg6[%c0_12, %c0_13] : memref<256x128xbf16, #tpu.memory_space<vmem>>, vector<256x128xbf16>
    %cst_14 = arith.constant dense<0.000000e+00> : vector<16x128xf32>
    %19 = tpu.matmul %17, %18, %cst_14 {dimension_numbers = #tpu.dot_dimension_numbers<[1], [0], [0], [1], [0, 0, 1, 1], [], []>} : vector<16x256xbf16>, vector<256x128xbf16>, vector<16x128xf32> -> vector<16x128xf32>
    %c0_15 = arith.constant 0 : index
    %c0_16 = arith.constant 0 : index
    %20 = vector.load %arg7[%c0_15, %c0_16] : memref<1x128xf32, #tpu.memory_space<vmem>>, vector<1x128xf32>
    %21 = vector.broadcast %20 : vector<1x128xf32> to vector<16x128xf32>
    %22 = arith.addf %19, %21 : vector<16x128xf32>
    %c0_17 = arith.constant 0 : index
    %c0_18 = arith.constant 0 : index
    %23 = vector.load %arg8[%c0_17, %c0_18] : memref<16x128xf32, #tpu.memory_space<vmem>>, vector<16x128xf32>
    tpu.vector_store %arg8[%c0_17, %c0_18], %22 {strides = array<i32>} : memref<16x128xf32, #tpu.memory_space<vmem>>, vector<16x128xf32>,
    return
  }
  func.func @transform_0(%arg0: i32) -> (i32, i32) {
    %c0_i32 = arith.constant 0 : i32
    %c0_i32_0 = arith.constant 0 : i32
    return %arg0, %c0_i32 : i32, i32
  }
  func.func @transform_1(%arg0: i32) -> (i32, i32) {
    %c0_i32 = arith.constant 0 : i32
    %c0_i32_0 = arith.constant 0 : i32
    %c0_i32_1 = arith.constant 0 : i32
    return %c0_i32, %c0_i32_0 : i32, i32
  }
  func.func @transform_2(%arg0: i32) -> (i32, i32) {
    %c0_i32 = arith.constant 0 : i32
    %c0_i32_0 = arith.constant 0 : i32
    %c0_i32_1 = arith.constant 0 : i32
    return %c0_i32, %c0_i32_0 : i32, i32
  }
  func.func @transform_3(%arg0: i32) -> (i32, i32) {
    %c0_i32 = arith.constant 0 : i32
    %c0_i32_0 = arith.constant 0 : i32
    %c0_i32_1 = arith.constant 0 : i32
    return %c0_i32, %c0_i32_0 : i32, i32
  }
  func.func @transform_4(%arg0: i32) -> (i32, i32) {
    %c0_i32 = arith.constant 0 : i32
    %c0_i32_0 = arith.constant 0 : i32
    %c0_i32_1 = arith.constant 0 : i32
    return %c0_i32, %c0_i32_0 : i32, i32
  }
  func.func @transform_5(%arg0: i32) -> (i32, i32) {
    %c0_i32 = arith.constant 0 : i32
    %c0_i32_0 = arith.constant 0 : i32
    %c0_i32_1 = arith.constant 0 : i32
    return %c0_i32, %c0_i32_0 : i32, i32
  }
  func.func @transform_6(%arg0: i32) -> (i32, i32) {
    %c0_i32 = arith.constant 0 : i32
    %c0_i32_0 = arith.constant 0 : i32
    %c0_i32_1 = arith.constant 0 : i32
    return %c0_i32, %c0_i32_0 : i32, i32
  }
  func.func @transform_7(%arg0: i32) -> (i32, i32) {
    %c0_i32 = arith.constant 0 : i32
    %c0_i32_0 = arith.constant 0 : i32
    return %arg0, %c0_i32 : i32, i32
  }
}

</mosaic_0001>

<bundles_post_ra>
// kernel: tpu_custom_call.1
= control target key start
LH: loop header
LB: loop body
LE: loop exit
PB: predicated region body
PF: predicated region fallthrough
CT: control target
= control target key end

     0   :  { %12 = vsyncpa [#allocation3], 0  ;;  %s2688_s0 = inlined_call_operand.hbm [shape: f32[16,972], index: 0, kind: input, shape index: {}]   ;;  %s2689_s1 = inlined_call_operand.hbm [shape: bf16[972,256], index: 1, kind: input, shape index: {}]   ;;  %s2690_s2 = inlined_call_operand.hbm [shape: f32[1,256], index: 2, kind: input, shape index: {}]   ;;  %s2691_s3 = inlined_call_operand.hbm [shape: bf16[256,256], index: 3, kind: input, shape index: {}]   ;;  %s2692_s4 = inlined_call_operand.vmem [shape: f32[1,256], index: 4, kind: input, shape index: {}]   ;;  %s2693_s5 = inlined_call_operand.hbm [shape: bf16[256,128], index: 5, kind: input, shape index: {}]   ;;  %s2694_s6 = inlined_call_operand.vmem [shape: f32[1,128], index: 6, kind: input, shape index: {}]   ;;  %s2695_s7 = inlined_call_operand.hbm [shape: f32[16,128], index: 7, kind: output, shape index: {}]  }
   0x1   :  { %13 = vsyncpa [#allocation6], 0 }
   0x2   :  { %14 = vsyncpa [#allocation9], 0  ;;  %s33_s26 = sshll.u32 %s2689_s1, 4  ;;  %s34_s26 = int_to_ptr.hbm [resolvable:$true] %s33_s26 }
   0x3   :  { %15 = vsyncpa [#allocation4], 0  ;;  %s2564_s27 = smov [#allocation5]   ;;  %s57_s8 = sshll.u32 %s2691_s3, 4  ;;  %s58_s8 = int_to_ptr.hbm [resolvable:$true] %s57_s8 }
   0x4   :  { %s35_s28 = sshll.u32 %s2564_s27, 4  ;;  %s2565_s9 = smov 128   ;;  %s36_s28 = int_to_ptr.vmem [resolvable:$true] %s35_s28 }
   0x5   :  { %s2566_s10 = smov 8   ;;  %s2567_s11 = smov [#allocation8]  }
   0x6   :  { %41 = dma.hbm_to_vmem [thread:$0]  %s34_s26, 15616, %s36_s28, [#allocation6], %s2565_s9, %s2565_s9, %s2566_s10  }
   0x7   :  { %s59_s12 = sshll.u32 %s2567_s11, 4  ;;  %s20_s14 = sshll.u32 %s2688_s0, 4  ;;  %s60_s12 = int_to_ptr.vmem [resolvable:$true] %s59_s12  ;;  %s21_s14 = int_to_ptr.hbm [resolvable:$true] %s20_s14 }
   0x8   :  { %65 = dma.hbm_to_vmem [thread:$0]  %s58_s8, 4096, %s60_s12, [#allocation9], %s2565_s9, %s2565_s9, %s2566_s10  }
   0x9   :  { %s2568_s3 = smov [#allocation2]   ;;  %s47_s18 = sshll.u32 %s2690_s2, 4  ;;  %s48_s18 = int_to_ptr.hbm [resolvable:$true] %s47_s18 }
   0xa   :  { %s22_s15 = sshll.u32 %s2568_s3, 4  ;;  %s2569_s19 = smov 1024   ;;  %s23_s15 = int_to_ptr.vmem [resolvable:$true] %s22_s15 }
   0xb   :  { %s2570_s20 = smov 64   ;;  %s2571_s21 = smov [#allocation7]  }
   0xc   :  { %28 = dma.hbm_to_vmem [thread:$0]  %s21_s14, 2048, %s23_s15, [#allocation3], %s2569_s19, %s2569_s19, %s2570_s20  }
   0xd   :  { %s49_s22 = sshll.u32 %s2571_s21, 4  ;;  %s72_s24 = sshll.u32 %s2693_s5, 4  ;;  %s50_s22 = int_to_ptr.vmem [resolvable:$true] %s49_s22  ;;  %s73_s24 = int_to_ptr.hbm [resolvable:$true] %s72_s24 }
   0xe   :  { %52 = dma.hbm_to_vmem [thread:$0]  %s48_s18, 32, %s50_s22, [#allocation6]  }
   0xf   :  { %s2572_s25 = smov [#allocation10]   ;;  %s2573_s27 = smov 4  }
  0x10   :  { %s74_s26 = sshll.u32 %s2572_s25, 4  ;;  %s75_s26 = int_to_ptr.vmem [resolvable:$true] %s74_s26 }
  0x11   :  { %80 = dma.hbm_to_vmem [thread:$0]  %s73_s24, 2048, %s75_s26, [#allocation9], %s2570_s20, %s2570_s20, %s2573_s27  }
  0x12   :  { %2556 = dma.done.wait [#allocation3], 2048  }
  0x13   :  { %2557 = vsyncadd [#allocation3], 4294965248 }
  0x14   :  { %2558 = dma.done.wait [#allocation6], 15648  }
  0x15   :  { %2559 = vsyncadd [#allocation6], 4294951648 }
  0x16   :  { %2560 = dma.done.wait [#allocation9], 6144  }
  0x17   :  { %2561 = vsyncadd [#allocation9], 4294961152  ;;  %v1606_v0 = vld [vmem:[#allocation5 + $0x70] sm:$0xf]  ;;  %v2245_v1 = vld [vmem:[#allocation5 + $0x74] sm:$0xf0] }
  0x18   :  { %v1670_v2 = vld [vmem:[#allocation5 + $0xf0] sm:$0xf]  ;;  %v1607_v3 = vor.u32 %v2245_v1, %v1606_v0  ;;  %v2261_v4 = vld [vmem:[#allocation5 + $0xf4] sm:$0xf0]  ;;  %v1598_v11 = vld [vmem:[#allocation5 + $0x60] sm:$0xf] }
  0x19   :  { %v1734_v5 = vld [vmem:[#allocation5 + $0x170] sm:$0xf]  ;;  %v2277_v6 = vld [vmem:[#allocation5 + $0x174] sm:$0xf0]  ;;  %v1671_v7 = vor.u32 %v2261_v4, %v1670_v2  ;;  %v2243_v13 = vld [vmem:[#allocation5 + $0x64] sm:$0xf0] }
  0x1a   :  { %v1735_v8 = vor.u32 %v2277_v6, %v1734_v5  ;;  %v1798_v9 = vld [vmem:[#allocation5 + $0x1f0] sm:$0xf]  ;;  %v2293_v10 = vld [vmem:[#allocation5 + $0x1f4] sm:$0xf0]  ;;  %875 = vmatpush.bf16.msra.mxu0 %v1607_v3  ;;  %v1662_v14 = vld [vmem:[#allocation5 + $0xe0] sm:$0xf]  ;;  %v1599_v16 = vor.u32 %v2243_v13, %v1598_v11 }
  0x1b   :  { %v1799_v12 = vor.u32 %v2293_v10, %v1798_v9  ;;  %v2259_v15 = vld [vmem:[#allocation5 + $0xe4] sm:$0xf0]  ;;  %889 = vmatpush.bf16.msra.mxu1 %v1671_v7  ;;  %v1726_v18 = vld [vmem:[#allocation5 + $0x160] sm:$0xf]  ;;  %v1590_v23 = vld [vmem:[#allocation5 + $0x50] sm:$0xf] }
  0x1c   :  { %903 = vmatpush.bf16.msra.mxu2 %v1735_v8  ;;  %v1663_v17 = vor.u32 %v2259_v15, %v1662_v14  ;;  %v2275_v19 = vld [vmem:[#allocation5 + $0x164] sm:$0xf0]  ;;  %v1790_v20 = vld [vmem:[#allocation5 + $0x1e0] sm:$0xf]  ;;  %v2241_v24 = vld [vmem:[#allocation5 + $0x54] sm:$0xf0] }
  0x1d   :  { %917 = vmatpush.bf16.msra.mxu3 %v1799_v12  ;;  %v1727_v21 = vor.u32 %v2275_v19, %v1726_v18  ;;  %v2291_v22 = vld [vmem:[#allocation5 + $0x1e4] sm:$0xf0]  ;;  %v1654_v26 = vld [vmem:[#allocation5 + $0xd0] sm:$0xf]  ;;  %v2257_v27 = vld [vmem:[#allocation5 + $0xd4] sm:$0xf0]  ;;  %v1591_v29 = vor.u32 %v2241_v24, %v1590_v23 }
  0x1e   :  { %v1791_v25 = vor.u32 %v2291_v22, %v1790_v20  ;;  %v1718_v28 = vld [vmem:[#allocation5 + $0x150] sm:$0xf]  ;;  %876 = vmatpush.bf16.msra.mxu0 %v1599_v16  ;;  %v2273_v30 = vld [vmem:[#allocation5 + $0x154] sm:$0xf0]  ;;  %v1655_v33 = vor.u32 %v2257_v27, %v1654_v26  ;;  %v1582_v35 = vld [vmem:[#allocation5 + $0x40] sm:$0xf] }
  0x1f   :  { %v1782_v31 = vld [vmem:[#allocation5 + $0x1d0] sm:$0xf]  ;;  %v2289_v32 = vld [vmem:[#allocation5 + $0x1d4] sm:$0xf0]  ;;  %890 = vmatpush.bf16.msra.mxu1 %v1663_v17  ;;  %v1719_v34 = vor.u32 %v2273_v30, %v1718_v28  ;;  %v2239_v36 = vld [vmem:[#allocation5 + $0x44] sm:$0xf0] }
  0x20   :  { %904 = vmatpush.bf16.msra.mxu2 %v1727_v21  ;;  %v1646_v37 = vld [vmem:[#allocation5 + $0xc0] sm:$0xf]  ;;  %v1783_v38 = vor.u32 %v2289_v32, %v1782_v31  ;;  %v2255_v39 = vld [vmem:[#allocation5 + $0xc4] sm:$0xf0]  ;;  %v1583_v44 = vor.u32 %v2239_v36, %v1582_v35  ;;  %v1574_v47 = vld [vmem:[#allocation5 + $0x30] sm:$0xf] }
  0x21   :  { %918 = vmatpush.bf16.msra.mxu3 %v1791_v25  ;;  %v1710_v40 = vld [vmem:[#allocation5 + $0x140] sm:$0xf]  ;;  %v2271_v41 = vld [vmem:[#allocation5 + $0x144] sm:$0xf0]  ;;  %v1647_v45 = vor.u32 %v2255_v39, %v1646_v37  ;;  %v2237_v48 = vld [vmem:[#allocation5 + $0x34] sm:$0xf0] }
  0x22   :  { %v1774_v42 = vld [vmem:[#allocation5 + $0x1c0] sm:$0xf]  ;;  %v2287_v43 = vld [vmem:[#allocation5 + $0x1c4] sm:$0xf0]  ;;  %877 = vmatpush.bf16.msra.mxu0 %v1591_v29  ;;  %v1711_v46 = vor.u32 %v2271_v41, %v1710_v40  ;;  %v1638_v49 = vld [vmem:[#allocation5 + $0xb0] sm:$0xf]  ;;  %v1575_v56 = vor.u32 %v2237_v48, %v1574_v47 }
  0x23   :  { %891 = vmatpush.bf16.msra.mxu1 %v1655_v33  ;;  %v1775_v50 = vor.u32 %v2287_v43, %v1774_v42  ;;  %v2253_v51 = vld [vmem:[#allocation5 + $0xb4] sm:$0xf0]  ;;  %v1702_v52 = vld [vmem:[#allocation5 + $0x130] sm:$0xf]  ;;  %v1566_v59 = vld [vmem:[#allocation5 + $0x20] sm:$0xf] }
  0x24   :  { %905 = vmatpush.bf16.msra.mxu2 %v1719_v34  ;;  %v2269_v53 = vld [vmem:[#allocation5 + $0x134] sm:$0xf0]  ;;  %v1766_v54 = vld [vmem:[#allocation5 + $0x1b0] sm:$0xf]  ;;  %v1639_v57 = vor.u32 %v2253_v51, %v1638_v49  ;;  %v2235_v60 = vld [vmem:[#allocation5 + $0x24] sm:$0xf0] }
  0x25   :  { %919 = vmatpush.bf16.msra.mxu3 %v1783_v38  ;;  %v2285_v55 = vld [vmem:[#allocation5 + $0x1b4] sm:$0xf0]  ;;  %v1703_v58 = vor.u32 %v2269_v53, %v1702_v52  ;;  %v1630_v61 = vld [vmem:[#allocation5 + $0xa0] sm:$0xf]  ;;  %v2251_v63 = vld [vmem:[#allocation5 + $0xa4] sm:$0xf0]  ;;  %v1567_v4 = vor.u32 %v2235_v60, %v1566_v59 }
  0x26   :  { %878 = vmatpush.bf16.msra.mxu0 %v1583_v44  ;;  %v1767_v62 = vor.u32 %v2285_v55, %v1766_v54  ;;  %v1694_v0 = vld [vmem:[#allocation5 + $0x120] sm:$0xf]  ;;  %v2267_v1 = vld [vmem:[#allocation5 + $0x124] sm:$0xf0]  ;;  %v1631_v5 = vor.u32 %v2251_v63, %v1630_v61  ;;  %v1558_v7 = vld [vmem:[#allocation5 + $0x10] sm:$0xf] }
  0x27   :  { %892 = vmatpush.bf16.msra.mxu1 %v1647_v45  ;;  %v1758_v2 = vld [vmem:[#allocation5 + $0x1a0] sm:$0xf]  ;;  %v2283_v3 = vld [vmem:[#allocation5 + $0x1a4] sm:$0xf0]  ;;  %v1695_v6 = vor.u32 %v2267_v1, %v1694_v0  ;;  %v2233_v8 = vld [vmem:[#allocation5 + $0x14] sm:$0xf0] }
  0x28   :  { %906 = vmatpush.bf16.msra.mxu2 %v1711_v46  ;;  %v1622_v9 = vld [vmem:[#allocation5 + $0x90] sm:$0xf]  ;;  %v1759_v10 = vor.u32 %v2283_v3, %v1758_v2  ;;  %v2249_v11 = vld [vmem:[#allocation5 + $0x94] sm:$0xf0]  ;;  %v1550_v16 = vld [vmem:[#allocation5] sm:$0xf]  ;;  %v1559_v17 = vor.u32 %v2233_v8, %v1558_v7 }
  0x29   :  { %920 = vmatpush.bf16.msra.mxu3 %v1775_v50  ;;  %v1686_v12 = vld [vmem:[#allocation5 + $0x110] sm:$0xf]  ;;  %v2265_v13 = vld [vmem:[#allocation5 + $0x114] sm:$0xf0]  ;;  %v2231_v18 = vld [vmem:[#allocation5 + $0x4] sm:$0xf0]  ;;  %v1623_v21 = vor.u32 %v2249_v11, %v1622_v9 }
  0x2a   :  { %879 = vmatpush.bf16.msra.mxu0 %v1575_v56  ;;  %v1750_v14 = vld [vmem:[#allocation5 + $0x190] sm:$0xf]  ;;  %v2281_v15 = vld [vmem:[#allocation5 + $0x194] sm:$0xf0]  ;;  %v1614_v19 = vld [vmem:[#allocation5 + $0x80] sm:$0xf]  ;;  %v1687_v22 = vor.u32 %v2265_v13, %v1686_v12  ;;  %v1551_v33 = vor.u32 %v2231_v18, %v1550_v16 }
  0x2b   :  { %893 = vmatpush.bf16.msra.mxu1 %v1639_v57  ;;  %v2247_v20 = vld [vmem:[#allocation5 + $0x84] sm:$0xf0]  ;;  %v1678_v23 = vld [vmem:[#allocation5 + $0x100] sm:$0xf]  ;;  %v1751_v26 = vor.u32 %v2281_v15, %v1750_v14  ;;  %v1862_v30 = vld [vmem:[#allocation5 + $0x270] sm:$0xf] }
  0x2c   :  { %907 = vmatpush.bf16.msra.mxu2 %v1703_v58  ;;  %v2030_v24 = vld [vmem:[#allocation5 + $0x3c0] sm:$0xf]  ;;  %v2351_v25 = vld [vmem:[#allocation5 + $0x3c4] sm:$0x30]  ;;  %v2309_v31 = vld [vmem:[#allocation5 + $0x274] sm:$0xf0]  ;;  %v1615_v38 = vor.u32 %v2247_v20, %v1614_v19 }
  0x2d   :  { %921 = vmatpush.bf16.msra.mxu3 %v1767_v62  ;;  %v2263_v27 = vld [vmem:[#allocation5 + $0x104] sm:$0xf0]  ;;  %v1742_v28 = vld [vmem:[#allocation5 + $0x180] sm:$0xf]  ;;  %v1926_v32 = vld [vmem:[#allocation5 + $0x2f0] sm:$0xf]  ;;  %v2031_v37 = vor.u32 %v2351_v25, %v2030_v24  ;;  %v1863_v42 = vor.u32 %v2309_v31, %v1862_v30 }
  0x2e   :  { %880 = vmatpush.bf16.msra.mxu0 %v1567_v4  ;;  %v2279_v29 = vld [vmem:[#allocation5 + $0x184] sm:$0xf0]  ;;  %v2325_v34 = vld [vmem:[#allocation5 + $0x2f4] sm:$0xf0]  ;;  %v1990_v35 = vld [vmem:[#allocation5 + $0x370] sm:$0xf]  ;;  %v1679_v39 = vor.u32 %v2263_v27, %v1678_v23 }
  0x2f   :  { %894 = vmatpush.bf16.msra.mxu1 %v1631_v5  ;;  %v2341_v36 = vld [vmem:[#allocation5 + $0x374] sm:$0xf0]  ;;  %vm868_vm0 = vcmask 1045504   ;;  %v106_v40 = vld [vmem:[#allocation2 + $0x10] sm:$0xff]  ;;  %v1743_v41 = vor.u32 %v2279_v29, %v1742_v28  ;;  %v1854_v43 = vld [vmem:[#allocation5 + $0x260] sm:$0xf]  ;;  %v1927_v46 = vor.u32 %v2325_v34, %v1926_v32 }
  0x30   :  { %908 = vmatpush.bf16.msra.mxu2 %v1695_v6  ;;  %v2307_v44 = vld [vmem:[#allocation5 + $0x264] sm:$0xf0]  ;;  %v1918_v45 = vld [vmem:[#allocation5 + $0x2e0] sm:$0xf]  ;;  %v1991_v47 = vor.u32 %v2341_v36, %v1990_v35  ;;  %v114_v50 = vld [vmem:[#allocation2 + $0x50] sm:$0xff]  ;;  %v870_v51 = vsel %vm868_vm0, %v2031_v37, 0 }
  0x31   :  { %922 = vmatpush.bf16.msra.mxu3 %v1759_v10  ;;  %v2323_v48 = vld [vmem:[#allocation5 + $0x2e4] sm:$0xf0]  ;;  %v1982_v49 = vld [vmem:[#allocation5 + $0x360] sm:$0xf]  ;;  %v2022_v53 = vld [vmem:[#allocation5 + $0x3b0] sm:$0xf]  ;;  %v2637_v54 = vpack.c.bf16 %v114_v50, %v106_v40  ;;  %v1855_v58 = vor.u32 %v2307_v44, %v1854_v43 }
  0x32   :  { %881 = vmatpush.bf16.msra.mxu0 %v1559_v17  ;;  %v2339_v52 = vld [vmem:[#allocation5 + $0x364] sm:$0xf0]  ;;  %v2349_v55 = vld [vmem:[#allocation5 + $0x3b4] sm:$0xf0]  ;;  %v1846_v56 = vld [vmem:[#allocation5 + $0x250] sm:$0xf]  ;;  %v1919_v63 = vor.u32 %v2323_v48, %v1918_v45 }
  0x33   :  { %895 = vmatpush.bf16.msra.mxu1 %v1623_v21  ;;  %v2305_v57 = vld [vmem:[#allocation5 + $0x254] sm:$0xf0]  ;;  %v1910_v59 = vld [vmem:[#allocation5 + $0x2d0] sm:$0xf]  ;;  %v104_v62 = vld [vmem:[#allocation2] sm:$0xff]  ;;  %v1983_v0 = vor.u32 %v2339_v52, %v1982_v49  ;;  %v2023_v4 = vor.u32 %v2349_v55, %v2022_v53  ;;  %vm864_vm1 = vcmask 621568  }
  0x34   :  { %909 = vmatpush.bf16.msra.mxu2 %v1687_v22  ;;  %v2321_v60 = vld [vmem:[#allocation5 + $0x2d4] sm:$0xf0]  ;;  %v1974_v61 = vld [vmem:[#allocation5 + $0x350] sm:$0xf]  ;;  %v112_v1 = vld [vmem:[#allocation2 + $0x40] sm:$0xff]  ;;  %v1847_v13 = vor.u32 %v2305_v57, %v1846_v56  ;;  %s2574_s29 = smov [#allocation11]  }
  0x35   :  { %923 = vmatpush.bf16.msra.mxu3 %v1751_v26  ;;  %v107_v2 = vld [vmem:[#allocation2 + $0x18] sm:$0xff]  ;;  %v2640_v6 = vpack.c.bf16 %v112_v1, %v104_v62  ;;  %v105_v8 = vld [vmem:[#allocation2 + $0x8] sm:$0xff]  ;;  %v2014_v10 = vld [vmem:[#allocation5 + $0x3a0] sm:$0xf]  ;;  %v1911_v14 = vor.u32 %v2321_v60, %v1910_v59  ;;  %s1531_s30 = sshll.u32 %s2574_s29, 4  ;;  %s1533_s12 = sshll.u32 %s2695_s7, 4  ;;  %s1532_s30 = int_to_ptr.vmem [resolvable:$true] %s1531_s30  ;;  %s1534_s12 = int_to_ptr.hbm [resolvable:$true] %s1533_s12 }
  0x36   :  { %882 = vmatpush.bf16.msra.mxu0 %v1551_v33  ;;  %v115_v3 = vld [vmem:[#allocation2 + $0x58] sm:$0xff]  ;;  %v113_v9 = vld [vmem:[#allocation2 + $0x48] sm:$0xff]  ;;  %v1838_v16 = vld [vmem:[#allocation5 + $0x240] sm:$0xf] }
  0x37   :  { %896 = vmatpush.bf16.msra.mxu1 %v1615_v38  ;;  %v2337_v5 = vld [vmem:[#allocation5 + $0x354] sm:$0xf0]  ;;  %v2642_v7 = vpack.c.bf16 %v115_v3, %v107_v2  ;;  %v2347_v11 = vld [vmem:[#allocation5 + $0x3a4] sm:$0xf0]  ;;  %v2644_v12 = vpack.c.bf16 %v113_v9, %v105_v8  ;;  %v1902_v18 = vld [vmem:[#allocation5 + $0x2c0] sm:$0xf] }
  0x38   :  { %910 = vmatpush.bf16.msra.mxu2 %v1679_v39  ;;  %v1975_v15 = vor.u32 %v2337_v5, %v1974_v61  ;;  %v2303_v17 = vld [vmem:[#allocation5 + $0x244] sm:$0xf0]  ;;  %v2015_v19 = vor.u32 %v2347_v11, %v2014_v10  ;;  %v1966_v21 = vld [vmem:[#allocation5 + $0x340] sm:$0xf]  ;;  %v2006_v23 = vld [vmem:[#allocation5 + $0x390] sm:$0xf] }
  0x39   :  { %924 = vmatpush.bf16.msra.mxu3 %v1743_v41  ;;  %v2319_v20 = vld [vmem:[#allocation5 + $0x2c4] sm:$0xf0]  ;;  %883 = vmatmul.bf16.vlgmr.msra.gmra.mxu0 %v2640_v6  ;;  %v2345_v24 = vld [vmem:[#allocation5 + $0x394] sm:$0xf0]  ;;  %v1839_v25 = vor.u32 %v2303_v17, %v1838_v16  ;;  %v1830_v28 = vld [vmem:[#allocation5 + $0x230] sm:$0xf] }
  0x3a   :  { %931 = vmatpush.bf16.msrb.mxu0 %v1863_v42  ;;  %v2335_v22 = vld [vmem:[#allocation5 + $0x344] sm:$0xf0]  ;;  %897 = vmatmul.bf16.vlgmr.msra.gmra.mxu1 %v2644_v12  ;;  %v1903_v26 = vor.u32 %v2319_v20, %v1902_v18  ;;  %v2301_v29 = vld [vmem:[#allocation5 + $0x234] sm:$0xf0]  ;;  %v1894_v30 = vld [vmem:[#allocation5 + $0x2b0] sm:$0xf]  ;;  %v2007_v31 = vor.u32 %v2345_v24, %v2006_v23 }
  0x3b   :  { %945 = vmatpush.bf16.msrb.mxu1 %v1927_v46  ;;  %911 = vmatmul.bf16.vlgmr.msra.gmra.mxu2 %v2637_v54  ;;  %v1967_v27 = vor.u32 %v2335_v22, %v1966_v21  ;;  %v2317_v32 = vld [vmem:[#allocation5 + $0x2b4] sm:$0xf0]  ;;  %v1958_v33 = vld [vmem:[#allocation5 + $0x330] sm:$0xf]  ;;  %v1998_v35 = vld [vmem:[#allocation5 + $0x380] sm:$0xf]  ;;  %v1831_v37 = vor.u32 %v2301_v29, %v1830_v28 }
  0x3c   :  { %959 = vmatpush.bf16.msrb.mxu2 %v1991_v47  ;;  %925 = vmatmul.bf16.vlgmr.msra.gmra.mxu3 %v2642_v7  ;;  %v2333_v34 = vld [vmem:[#allocation5 + $0x334] sm:$0xf0]  ;;  %v2343_v36 = vld [vmem:[#allocation5 + $0x384] sm:$0xf0]  ;;  %v2244_v38 = vld [vmem:[#allocation5 + $0x74] sm:$0xf]  ;;  %v1895_v40 = vor.u32 %v2317_v32, %v1894_v30 }
  0x3d   :  { %976 = vmatpush.bf16.msrb.mxu3 %v870_v51  ;;  %v1608_v39 = vld [vmem:[#allocation5 + $0x78] sm:$0xf0]  ;;  %v1959_v41 = vor.u32 %v2333_v34, %v1958_v33  ;;  %v1822_v42 = vld [vmem:[#allocation5 + $0x220] sm:$0xf]  ;;  %v2299_v43 = vld [vmem:[#allocation5 + $0x224] sm:$0xf0]  ;;  %v1999_v45 = vor.u32 %v2343_v36, %v1998_v35 }
  0x3e   :  { %932 = vmatpush.bf16.msrb.mxu0 %v1855_v58  ;;  %v1886_v44 = vld [vmem:[#allocation5 + $0x2a0] sm:$0xf]  ;;  %v2315_v46 = vld [vmem:[#allocation5 + $0x2a4] sm:$0xf0]  ;;  %v1611_v49 = vor.u32 %v2244_v38, %v1608_v39  ;;  %v2242_v50 = vld [vmem:[#allocation5 + $0x64] sm:$0xf]  ;;  %v1823_v51 = vor.u32 %v2299_v43, %v1822_v42 }
  0x3f   :  { %946 = vmatpush.bf16.msrb.mxu1 %v1919_v63  ;;  %v1950_v47 = vld [vmem:[#allocation5 + $0x320] sm:$0xf]  ;;  %v2331_v48 = vld [vmem:[#allocation5 + $0x324] sm:$0xf0]  ;;  %v1600_v52 = vld [vmem:[#allocation5 + $0x68] sm:$0xf0]  ;;  %v1887_v56 = vor.u32 %v2315_v46, %v1886_v44 }
  0x40   :  { %960 = vmatpush.bf16.msrb.mxu2 %v1983_v0  ;;  %v1814_v53 = vld [vmem:[#allocation5 + $0x210] sm:$0xf]  ;;  %v2297_v55 = vld [vmem:[#allocation5 + $0x214] sm:$0xf0]  ;;  %v1951_v57 = vor.u32 %v2331_v48, %v1950_v47  ;;  %v1603_v0 = vor.u32 %v2242_v50, %v1600_v52  ;;  %v2240_v1 = vld [vmem:[#allocation5 + $0x54] sm:$0xf] }
  0x41   :  { %977 = vmatpush.bf16.msrb.mxu3 %v2023_v4  ;;  %v1878_v58 = vld [vmem:[#allocation5 + $0x290] sm:$0xf]  ;;  %v2313_v59 = vld [vmem:[#allocation5 + $0x294] sm:$0xf0]  ;;  %v1592_v2 = vld [vmem:[#allocation5 + $0x58] sm:$0xf0]  ;;  %v1815_v4 = vor.u32 %v2297_v55, %v1814_v53 }
  0x42   :  { %933 = vmatpush.bf16.msrb.mxu0 %v1847_v13  ;;  %v1942_v60 = vld [vmem:[#allocation5 + $0x310] sm:$0xf]  ;;  %v2329_v61 = vld [vmem:[#allocation5 + $0x314] sm:$0xf0]  ;;  %v1806_v5 = vld [vmem:[#allocation5 + $0x200] sm:$0xf]  ;;  %v1879_v10 = vor.u32 %v2313_v59, %v1878_v58 }
  0x43   :  { %947 = vmatpush.bf16.msrb.mxu1 %v1911_v14  ;;  %v111_v62 = vld [vmem:[#allocation2 + $0x38] sm:$0xff]  ;;  %v2295_v8 = vld [vmem:[#allocation5 + $0x204] sm:$0xf0]  ;;  %v1870_v9 = vld [vmem:[#allocation5 + $0x280] sm:$0xf]  ;;  %v1943_v11 = vor.u32 %v2329_v61, %v1942_v60 }
  0x44   :  { %961 = vmatpush.bf16.msrb.mxu2 %v1975_v15  ;;  %v119_v63 = vld [vmem:[#allocation2 + $0x78] sm:$0xff]  ;;  %v2311_v13 = vld [vmem:[#allocation5 + $0x284] sm:$0xf0]  ;;  %v1934_v14 = vld [vmem:[#allocation5 + $0x300] sm:$0xf]  ;;  %v1807_v23 = vor.u32 %v2295_v8, %v1806_v5 }
  0x45   :  { %978 = vmatpush.bf16.msrb.mxu3 %v2015_v19  ;;  %v2649_v3 = vpack.c.bf16 %v119_v63, %v111_v62  ;;  %v2327_v15 = vld [vmem:[#allocation5 + $0x304] sm:$0xf0]  ;;  %v2238_v16 = vld [vmem:[#allocation5 + $0x44] sm:$0xf]  ;;  %v1584_v17 = vld [vmem:[#allocation5 + $0x48] sm:$0xf0]  ;;  %v1595_v19 = vor.u32 %v2240_v1, %v1592_v2 }
  0x46   :  { %934 = vmatpush.bf16.msrb.mxu0 %v1839_v25  ;;  %v2260_v18 = vld [vmem:[#allocation5 + $0xf4] sm:$0xf]  ;;  %v1672_v20 = vld [vmem:[#allocation5 + $0xf8] sm:$0xf0]  ;;  %v108_v24 = vld [vmem:[#allocation2 + $0x20] sm:$0xff]  ;;  %v1935_v28 = vor.u32 %v2327_v15, %v1934_v14 }
  0x47   :  { %948 = vmatpush.bf16.msrb.mxu1 %v1903_v26  ;;  %v2276_v21 = vld [vmem:[#allocation5 + $0x174] sm:$0xf]  ;;  %v1736_v22 = vld [vmem:[#allocation5 + $0x178] sm:$0xf0]  ;;  %v116_v25 = vld [vmem:[#allocation2 + $0x60] sm:$0xff]  ;;  %v1675_v32 = vor.u32 %v2260_v18, %v1672_v20 }
  0x48   :  { %962 = vmatpush.bf16.msrb.mxu2 %v1967_v27  ;;  %v110_v26 = vld [vmem:[#allocation2 + $0x30] sm:$0xff]  ;;  %v1871_v27 = vor.u32 %v2311_v13, %v1870_v9  ;;  %v109_v30 = vld [vmem:[#allocation2 + $0x28] sm:$0xff]  ;;  %v1739_v33 = vor.u32 %v2276_v21, %v1736_v22  ;;  %v1800_v35 = vld [vmem:[#allocation5 + $0x1f8] sm:$0xf0]  ;;  %v2653_v38 = vpack.c.bf16 %v116_v25, %v108_v24 }
  0x49   :  { %979 = vmatpush.bf16.msrb.mxu3 %v2007_v31  ;;  %v118_v29 = vld [vmem:[#allocation2 + $0x70] sm:$0xff]  ;;  %v117_v31 = vld [vmem:[#allocation2 + $0x68] sm:$0xff]  ;;  %v2258_v36 = vld [vmem:[#allocation5 + $0xe4] sm:$0xf] }
  0x4a   :  { %935 = vmatpush.bf16.msrb.mxu0 %v1831_v37  ;;  %v2292_v34 = vld [vmem:[#allocation5 + $0x1f4] sm:$0xf]  ;;  %v1587_v37 = vor.u32 %v2238_v16, %v1584_v17  ;;  %v1664_v39 = vld [vmem:[#allocation5 + $0xe8] sm:$0xf0]  ;;  %v2655_v42 = vpack.c.bf16 %v118_v29, %v110_v26  ;;  %v2657_v43 = vpack.c.bf16 %v117_v31, %v109_v30  ;;  %v1656_v53 = vld [vmem:[#allocation5 + $0xd8] sm:$0xf0] }
  0x4b   :  { %949 = vmatpush.bf16.msrb.mxu1 %v1895_v40  ;;  %v2274_v40 = vld [vmem:[#allocation5 + $0x164] sm:$0xf]  ;;  %v2236_v44 = vld [vmem:[#allocation5 + $0x34] sm:$0xf]  ;;  %v1803_v46 = vor.u32 %v2292_v34, %v1800_v35  ;;  %v1667_v47 = vor.u32 %v2258_v36, %v1664_v39  ;;  %v1792_v50 = vld [vmem:[#allocation5 + $0x1e8] sm:$0xf0] }
  0x4c   :  { %963 = vmatpush.bf16.msrb.mxu2 %v1959_v41  ;;  %v1728_v41 = vld [vmem:[#allocation5 + $0x168] sm:$0xf0]  ;;  %v2272_v55 = vld [vmem:[#allocation5 + $0x154] sm:$0xf]  ;;  %v1784_v63 = vld [vmem:[#allocation5 + $0x1d8] sm:$0xf0] }
  0x4d   :  { %980 = vmatpush.bf16.msrb.mxu3 %v1999_v45  ;;  %v1576_v45 = vld [vmem:[#allocation5 + $0x38] sm:$0xf0]  ;;  %v1731_v48 = vor.u32 %v2274_v40, %v1728_v41  ;;  %v1568_v58 = vld [vmem:[#allocation5 + $0x28] sm:$0xf0]  ;;  %v2288_v62 = vld [vmem:[#allocation5 + $0x1d4] sm:$0xf] }
  0x4e   :  { %936 = vmatpush.bf16.msrb.mxu0 %v1823_v51  ;;  %v2256_v51 = vld [vmem:[#allocation5 + $0xd4] sm:$0xf]  ;;  %v1579_v52 = vor.u32 %v2236_v44, %v1576_v45  ;;  %v1648_v2 = vld [vmem:[#allocation5 + $0xc8] sm:$0xf0]  ;;  %v1560_v9 = vld [vmem:[#allocation5 + $0x18] sm:$0xf0] }
  0x4f   :  { %950 = vmatpush.bf16.msrb.mxu1 %v1887_v56  ;;  %v1720_v56 = vld [vmem:[#allocation5 + $0x158] sm:$0xf0]  ;;  %v1659_v60 = vor.u32 %v2256_v51, %v1656_v53  ;;  %v1712_v5 = vld [vmem:[#allocation5 + $0x148] sm:$0xf0]  ;;  %v2232_v8 = vld [vmem:[#allocation5 + $0x14] sm:$0xf] }
  0x50   :  { %964 = vmatpush.bf16.msrb.mxu2 %v1951_v57  ;;  %2036 = vmatmul.msk.bf16.vlgmr.msrb.gmra.mxu3 %vm864_vm1, %v2649_v3  ;;  %v2234_v57 = vld [vmem:[#allocation5 + $0x24] sm:$0xf]  ;;  %v1723_v61 = vor.u32 %v2272_v55, %v1720_v56  ;;  %v1776_v15 = vld [vmem:[#allocation5 + $0x1c8] sm:$0xf0]  ;;  %v2252_v16 = vld [vmem:[#allocation5 + $0xb4] sm:$0xf]  ;;  %v1563_v17 = vor.u32 %v2232_v8, %v1560_v9 }
  0x51   :  { %987 = vmatpush.bf16.msra.mxu3 %v1611_v49  ;;  %v2290_v49 = vld [vmem:[#allocation5 + $0x1e4] sm:$0xf]  ;;  %v1571_v1 = vor.u32 %v2234_v57, %v1568_v58  ;;  %v1640_v18 = vld [vmem:[#allocation5 + $0xb8] sm:$0xf0]  ;;  %v1552_v22 = vld [vmem:[#allocation5 + $0x8] sm:$0xf0] }
  0x52   :  { %937 = vmatpush.bf16.msrb.mxu0 %v1815_v4  ;;  %v1795_v59 = vor.u32 %v2290_v49, %v1792_v50  ;;  %v2270_v4 = vld [vmem:[#allocation5 + $0x144] sm:$0xf]  ;;  %v1704_v20 = vld [vmem:[#allocation5 + $0x138] sm:$0xf0]  ;;  %v2308_v24 = vld [vmem:[#allocation5 + $0x274] sm:$0xf]  ;;  %v1643_v26 = vor.u32 %v2252_v16, %v1640_v18 }
  0x53   :  { %951 = vmatpush.bf16.msrb.mxu1 %v1879_v10  ;;  %v1787_v10 = vor.u32 %v2288_v62, %v1784_v63  ;;  %v1715_v13 = vor.u32 %v2270_v4, %v1712_v5  ;;  %v2286_v14 = vld [vmem:[#allocation5 + $0x1c4] sm:$0xf]  ;;  %v1864_v25 = vld [vmem:[#allocation5 + $0x278] sm:$0xf0]  ;;  %v1696_v34 = vld [vmem:[#allocation5 + $0x128] sm:$0xf0] }
  0x54   :  { %965 = vmatpush.bf16.msrb.mxu2 %v1943_v11  ;;  %v2230_v21 = vld [vmem:[#allocation5 + $0x4] sm:$0xf]  ;;  %v1768_v29 = vld [vmem:[#allocation5 + $0x1b8] sm:$0xf0]  ;;  %v1867_v35 = vor.u32 %v2308_v24, %v1864_v25  ;;  %v1856_v39 = vld [vmem:[#allocation5 + $0x268] sm:$0xf0] }
  0x55   :  { %988 = vmatpush.bf16.msra.mxu3 %v1603_v0  ;;  %v2254_v0 = vld [vmem:[#allocation5 + $0xc4] sm:$0xf]  ;;  %v1555_v31 = vor.u32 %v2230_v21, %v1552_v22  ;;  %v1760_v45 = vld [vmem:[#allocation5 + $0x1a8] sm:$0xf0]  ;;  %v1688_v49 = vld [vmem:[#allocation5 + $0x118] sm:$0xf0] }
  0x56   :  { %938 = vmatpush.bf16.msrb.mxu0 %v1807_v23  ;;  %v1651_v11 = vor.u32 %v2254_v0, %v1648_v2  ;;  %v1779_v23 = vor.u32 %v2286_v14, %v1776_v15  ;;  %v2250_v30 = vld [vmem:[#allocation5 + $0xa4] sm:$0xf]  ;;  %v2304_v55 = vld [vmem:[#allocation5 + $0x254] sm:$0xf]  ;;  %v1848_v56 = vld [vmem:[#allocation5 + $0x258] sm:$0xf0] }
  0x57   :  { %952 = vmatpush.bf16.msrb.mxu1 %v1871_v27  ;;  %v2282_v44 = vld [vmem:[#allocation5 + $0x1a4] sm:$0xf]  ;;  %v2280_v57 = vld [vmem:[#allocation5 + $0x194] sm:$0xf]  ;;  %v1616_v62 = vld [vmem:[#allocation5 + $0x88] sm:$0xf0]  ;;  %v1851_v2 = vor.u32 %v2304_v55, %v1848_v56 }
  0x58   :  { %966 = vmatpush.bf16.msrb.mxu2 %v1935_v28  ;;  %v2284_v28 = vld [vmem:[#allocation5 + $0x1b4] sm:$0xf]  ;;  %v2350_v51 = vld [vmem:[#allocation5 + $0x3c4] sm:$0xf]  ;;  %v1763_v53 = vor.u32 %v2282_v44, %v1760_v45  ;;  %v1680_v0 = vld [vmem:[#allocation5 + $0x108] sm:$0xf0] }
  0x59   :  { %989 = vmatpush.bf16.msra.mxu3 %v1595_v19  ;;  %939 = vmatmul.bf16.vlgmr.msrb.gmra.mxu0 %v2653_v38  ;;  %v2268_v19 = vld [vmem:[#allocation5 + $0x134] sm:$0xf]  ;;  %v1771_v36 = vor.u32 %v2284_v28, %v1768_v29  ;;  %v2262_v63 = vld [vmem:[#allocation5 + $0x104] sm:$0xf]  ;;  %v1928_v4 = vld [vmem:[#allocation5 + $0x2f8] sm:$0xf0] }
  0x5a   :  { %1001 = vmatpush.bf16.msra.mxu0 %v1675_v32  ;;  %953 = vmatmul.bf16.vlgmr.msrb.gmra.mxu1 %v2657_v43  ;;  %v1707_v27 = vor.u32 %v2268_v19, %v1704_v20  ;;  %v1632_v32 = vld [vmem:[#allocation5 + $0xa8] sm:$0xf0]  ;;  %v2340_v5 = vld [vmem:[#allocation5 + $0x374] sm:$0xf]  ;;  %v1992_v8 = vld [vmem:[#allocation5 + $0x378] sm:$0xf0]  ;;  %v1683_v15 = vor.u32 %v2262_v63, %v1680_v0 }
  0x5b   :  { %1015 = vmatpush.bf16.msra.mxu1 %v1739_v33  ;;  %967 = vmatmul.bf16.vlgmr.msrb.gmra.mxu2 %v2655_v42  ;;  %v2266_v33 = vld [vmem:[#allocation5 + $0x124] sm:$0xf]  ;;  %v1635_v40 = vor.u32 %v2250_v30, %v1632_v32  ;;  %v1995_v18 = vor.u32 %v2340_v5, %v1992_v8  ;;  %v1920_v21 = vld [vmem:[#allocation5 + $0x2e8] sm:$0xf0]  ;;  %v2300_v25 = vld [vmem:[#allocation5 + $0x234] sm:$0xf] }
  0x5c   :  { %1029 = vmatpush.bf16.msra.mxu2 %v1803_v46  ;;  %v1699_v41 = vor.u32 %v2266_v33, %v1696_v34  ;;  %v2248_v46 = vld [vmem:[#allocation5 + $0x94] sm:$0xf]  ;;  %v2278_v16 = vld [vmem:[#allocation5 + $0x184] sm:$0xf]  ;;  %v1912_v34 = vld [vmem:[#allocation5 + $0x2d8] sm:$0xf0] }
  0x5d   :  { %990 = vmatpush.bf16.msra.mxu3 %v1587_v37  ;;  %v2306_v37 = vld [vmem:[#allocation5 + $0x264] sm:$0xf]  ;;  %v2348_v30 = vld [vmem:[#allocation5 + $0x3b4] sm:$0xf]  ;;  %v1808_v63 = vld [vmem:[#allocation5 + $0x208] sm:$0xf0] }
  0x5e   :  { %1002 = vmatpush.bf16.msra.mxu0 %v1667_v47  ;;  %v1624_v47 = vld [vmem:[#allocation5 + $0x98] sm:$0xf0]  ;;  %v1859_v50 = vor.u32 %v2306_v37, %v1856_v39  ;;  %v2322_v19 = vld [vmem:[#allocation5 + $0x2e4] sm:$0xf]  ;;  %v2320_v32 = vld [vmem:[#allocation5 + $0x2d4] sm:$0xf] }
  0x5f   :  { %1016 = vmatpush.bf16.msra.mxu1 %v1731_v48  ;;  %v2264_v48 = vld [vmem:[#allocation5 + $0x114] sm:$0xf]  ;;  %v1627_v58 = vor.u32 %v2248_v46, %v1624_v47  ;;  %v2338_v22 = vld [vmem:[#allocation5 + $0x364] sm:$0xf]  ;;  %v1923_v28 = vor.u32 %v2322_v19, %v1920_v21  ;;  %v1824_v39 = vld [vmem:[#allocation5 + $0x228] sm:$0xf0] }
  0x60   :  { %1030 = vmatpush.bf16.msra.mxu2 %v1795_v59  ;;  %v1691_v59 = vor.u32 %v2264_v48, %v1688_v49  ;;  %v2298_v37 = vld [vmem:[#allocation5 + $0x224] sm:$0xf]  ;;  %v2016_v46 = vld [vmem:[#allocation5 + $0x3a8] sm:$0xf0]  ;;  %v2344_v56 = vld [vmem:[#allocation5 + $0x394] sm:$0xf] }
  0x61   :  { %991 = vmatpush.bf16.msra.mxu3 %v1579_v52  ;;  %v2032_v52 = vld [vmem:[#allocation5 + $0x3c8] sm:$0x30]  ;;  %v2346_v45 = vld [vmem:[#allocation5 + $0x3a4] sm:$0xf]  ;;  %v1827_v48 = vor.u32 %v2298_v37, %v1824_v39  ;;  %v1944_v19 = vld [vmem:[#allocation5 + $0x318] sm:$0xf0] }
  0x62   :  { %1003 = vmatpush.bf16.msra.mxu0 %v1659_v60  ;;  %v1752_v60 = vld [vmem:[#allocation5 + $0x198] sm:$0xf0]  ;;  %v2318_v47 = vld [vmem:[#allocation5 + $0x2c4] sm:$0xf]  ;;  %v1904_v49 = vld [vmem:[#allocation5 + $0x2c8] sm:$0xf0] }
  0x63   :  { %1017 = vmatpush.bf16.msra.mxu1 %v1723_v61  ;;  %v2246_v61 = vld [vmem:[#allocation5 + $0x84] sm:$0xf]  ;;  %v1755_v9 = vor.u32 %v2280_v57, %v1752_v60  ;;  %v2008_v57 = vld [vmem:[#allocation5 + $0x398] sm:$0xf0]  ;;  %v2000_v5 = vld [vmem:[#allocation5 + $0x388] sm:$0xf0] }
  0x64   :  { %1031 = vmatpush.bf16.msra.mxu2 %v1787_v10  ;;  %v2302_v10 = vld [vmem:[#allocation5 + $0x244] sm:$0xf]  ;;  %v1619_v14 = vor.u32 %v2246_v61, %v1616_v62  ;;  %v1896_v60 = vld [vmem:[#allocation5 + $0x2b8] sm:$0xf0]  ;;  %v2332_v61 = vld [vmem:[#allocation5 + $0x334] sm:$0xf]  ;;  %v2011_v0 = vor.u32 %v2344_v56, %v2008_v57 }
  0x65   :  { %992 = vmatpush.bf16.msra.mxu3 %v1571_v1  ;;  %v2324_v1 = vld [vmem:[#allocation5 + $0x2f4] sm:$0xf]  ;;  %v2294_v62 = vld [vmem:[#allocation5 + $0x204] sm:$0xf]  ;;  %v2357_v57 = vld [vmem:[#allocation8 + $0x24] sm:$0xf0] }
  0x66   :  { %1004 = vmatpush.bf16.msra.mxu0 %v1651_v11  ;;  %v1840_v11 = vld [vmem:[#allocation5 + $0x248] sm:$0xf0]  ;;  %v1811_v8 = vor.u32 %v2294_v62, %v1808_v63  ;;  %v2080_v39 = vld [vmem:[#allocation8 + $0x50] sm:$0xf]  ;;  %v2056_v56 = vld [vmem:[#allocation8 + $0x20] sm:$0xf] }
  0x67   :  { %1018 = vmatpush.bf16.msra.mxu1 %v1715_v13  ;;  %v2035_v13 = vor.u32 %v2350_v51, %v2032_v52  ;;  %v1843_v20 = vor.u32 %v2302_v10, %v1840_v11  ;;  %v2296_v51 = vld [vmem:[#allocation5 + $0x214] sm:$0xf]  ;;  %v1816_v52 = vld [vmem:[#allocation5 + $0x218] sm:$0xf0]  ;;  %v1888_v10 = vld [vmem:[#allocation5 + $0x2a8] sm:$0xf0] }
  0x68   :  { %1032 = vmatpush.bf16.msra.mxu2 %v1779_v23  ;;  %v1984_v23 = vld [vmem:[#allocation5 + $0x368] sm:$0xf0]  ;;  %v2330_v11 = vld [vmem:[#allocation5 + $0x324] sm:$0xf] }
  0x69   :  { %993 = vmatpush.bf16.msra.mxu3 %v1563_v17  ;;  %v1744_v17 = vld [vmem:[#allocation5 + $0x188] sm:$0xf0]  ;;  %v1987_v29 = vor.u32 %v2338_v22, %v1984_v23  ;;  %v2310_v22 = vld [vmem:[#allocation5 + $0x284] sm:$0xf] }
  0x6a   :  { %1005 = vmatpush.bf16.msra.mxu0 %v1643_v26  ;;  %v1747_v24 = vor.u32 %v2278_v16, %v1744_v17  ;;  %v1832_v26 = vld [vmem:[#allocation5 + $0x238] sm:$0xf0]  ;;  %v2312_v17 = vld [vmem:[#allocation5 + $0x294] sm:$0xf]  ;;  %v1872_v23 = vld [vmem:[#allocation5 + $0x288] sm:$0xf0] }
  0x6b   :  { %1019 = vmatpush.bf16.msra.mxu1 %v1707_v27  ;;  %v873_v27 = vsel %vm868_vm0, %v2035_v13, 0  ;;  %v1835_v33 = vor.u32 %v2300_v25, %v1832_v26  ;;  %v1952_v13 = vld [vmem:[#allocation5 + $0x328] sm:$0xf0]  ;;  %v1875_v26 = vor.u32 %v2310_v22, %v1872_v23  ;;  %v2048_v63 = vld [vmem:[#allocation8 + $0x10] sm:$0xf] }
  0x6c   :  { %1033 = vmatpush.bf16.msra.mxu2 %v1771_v36  ;;  %v1976_v36 = vld [vmem:[#allocation5 + $0x358] sm:$0xf0]  ;;  %v1955_v16 = vor.u32 %v2330_v11, %v1952_v13  ;;  %v1936_v25 = vld [vmem:[#allocation5 + $0x308] sm:$0xf0]  ;;  %v2352_v13 = vld [vmem:[#allocation8 + $0x4] sm:$0xf] }
  0x6d   :  { %994 = vmatpush.bf16.msra.mxu3 %v1555_v31  ;;  %v2024_v31 = vld [vmem:[#allocation5 + $0x3b8] sm:$0xf0] }
  0x6e   :  { %1006 = vmatpush.bf16.msra.mxu0 %v1635_v40  ;;  %v2027_v40 = vor.u32 %v2348_v30, %v2024_v31  ;;  %v2098_v31 = vld [vmem:[#allocation8 + $0x78] sm:$0xf0]  ;;  %v2353_v11 = vld [vmem:[#allocation8 + $0x4] sm:$0xf0] }
  0x6f   :  { %1020 = vmatpush.bf16.msra.mxu1 %v1699_v41  ;;  %v1915_v41 = vor.u32 %v2320_v32, %v1912_v34  ;;  %v2364_v34 = vld [vmem:[#allocation8 + $0x64] sm:$0xf] }
  0x70   :  { %995 = vmatmul.bf16.vlgmr.msra.gmra.mxu3 %v2640_v6  ;;  %1034 = vmatpush.bf16.msra.mxu2 %v1763_v53  ;;  %v1931_v6 = vor.u32 %v2324_v1, %v1928_v4  ;;  %v2019_v53 = vor.u32 %v2346_v45, %v2016_v46  ;;  %v2342_v4 = vld [vmem:[#allocation5 + $0x384] sm:$0xf]  ;;  %v2072_v45 = vld [vmem:[#allocation8 + $0x40] sm:$0xf]  ;;  %v2361_v46 = vld [vmem:[#allocation8 + $0x44] sm:$0xf0] }
  0x71   :  { %1043 = vmatpush.bf16.msrb.mxu3 %v1867_v35  ;;  %v2336_v35 = vld [vmem:[#allocation5 + $0x354] sm:$0xf] }
  0x72   :  { %1007 = vmatpush.bf16.msra.mxu0 %v1627_v58  ;;  %v1979_v44 = vor.u32 %v2336_v35, %v1976_v36  ;;  %v2316_v58 = vld [vmem:[#allocation5 + $0x2b4] sm:$0xf]  ;;  %v2090_v36 = vld [vmem:[#allocation8 + $0x68] sm:$0xf0] }
  0x73   :  { %1021 = vmatpush.bf16.msra.mxu1 %v1691_v59  ;;  %v1819_v59 = vor.u32 %v2296_v51, %v1816_v52  ;;  %v1899_v1 = vor.u32 %v2316_v58, %v1896_v60  ;;  %v2093_v37 = vor.u32 %v2364_v34, %v2090_v36  ;;  %v2359_v51 = vld [vmem:[#allocation8 + $0x34] sm:$0xf0]  ;;  %v2358_v52 = vld [vmem:[#allocation8 + $0x34] sm:$0xf]  ;;  %v2356_v58 = vld [vmem:[#allocation8 + $0x24] sm:$0xf] }
  0x74   :  { %1035 = vmatpush.bf16.msra.mxu2 %v1755_v9  ;;  %v2314_v9 = vld [vmem:[#allocation5 + $0x2a4] sm:$0xf]  ;;  %v2058_v60 = vld [vmem:[#allocation8 + $0x28] sm:$0xf0] }
  0x75   :  { %1044 = vmatpush.bf16.msrb.mxu3 %v1859_v50  ;;  %v2334_v50 = vld [vmem:[#allocation5 + $0x344] sm:$0xf] }
  0x76   :  { %1008 = vmatpush.bf16.msra.mxu0 %v1619_v14  ;;  %v2003_v14 = vor.u32 %v2342_v4, %v2000_v5  ;;  %v2050_v4 = vld [vmem:[#allocation8 + $0x18] sm:$0xf0] }
  0x77   :  { %1022 = vmatpush.bf16.msra.mxu1 %v1683_v15  ;;  %v1891_v15 = vor.u32 %v2314_v9, %v1888_v10  ;;  %v2672_v5 = vld [vmem:[#allocation7] sm:$0x3]  ;;  %v2040_v10 = vld [vmem:[#allocation8] sm:$0xf] }
  0x78   :  { %1036 = vmatpush.bf16.msra.mxu2 %v1747_v24  ;;  %v2326_v24 = vld [vmem:[#allocation5 + $0x304] sm:$0xf] }
  0x79   :  { %1045 = vmatpush.bf16.msrb.mxu3 %v1851_v2  ;;  %1009 = vmatmul.bf16.vlgmr.msra.gmra.mxu0 %v2644_v12  ;;  %v1968_v12 = vld [vmem:[#allocation5 + $0x348] sm:$0xf0] }
  0x7a   :  { %1057 = vmatpush.bf16.msrb.mxu0 %v1931_v6  ;;  %1023 = vmatmul.bf16.vlgmr.msra.gmra.mxu1 %v2637_v54  ;;  %v1907_v54 = vor.u32 %v2318_v47, %v1904_v49  ;;  %v1971_v55 = vor.u32 %v2334_v50, %v1968_v12  ;;  %v1880_v6 = vld [vmem:[#allocation5 + $0x298] sm:$0xf0]  ;;  %v2360_v47 = vld [vmem:[#allocation8 + $0x44] sm:$0xf]  ;;  %v2064_v12 = vld [vmem:[#allocation8 + $0x30] sm:$0xf] }
  0x7b   :  { %1071 = vmatpush.bf16.msrb.mxu1 %v1995_v18  ;;  %1037 = vmatmul.bf16.vlgmr.msra.gmra.mxu2 %v2642_v7  ;;  %v1960_v7 = vld [vmem:[#allocation5 + $0x338] sm:$0xf0]  ;;  %v2328_v18 = vld [vmem:[#allocation5 + $0x314] sm:$0xf] }
  0x7c   :  { %1088 = vmatpush.bf16.msrb.mxu2 %v873_v27  ;;  %v1963_v2 = vor.u32 %v2332_v61, %v1960_v7  ;;  %v1947_v21 = vor.u32 %v2328_v18, %v1944_v19  ;;  %v1939_v27 = vor.u32 %v2326_v24, %v1936_v25  ;;  %v2074_v49 = vld [vmem:[#allocation8 + $0x48] sm:$0xf0]  ;;  %v2061_v61 = vor.u32 %v2356_v58, %v2058_v60  ;;  %v2144_v58 = vld [vmem:[#allocation8 + $0xd0] sm:$0xf]  ;;  %v2378_v60 = vld [vmem:[#allocation8 + $0xd4] sm:$0xf] }
  0x7d   :  { %1046 = vmatpush.bf16.msrb.mxu3 %v1843_v20  ;;  %v1883_v20 = vor.u32 %v2312_v17, %v1880_v6  ;;  %v2077_v50 = vor.u32 %v2360_v47, %v2074_v49 }
  0x7e   :  { %1058 = vmatpush.bf16.msrb.mxu0 %v1923_v28  ;;  %v2367_v28 = vld [vmem:[#allocation8 + $0x74] sm:$0xf0] }
  0x7f   :  { %1072 = vmatpush.bf16.msrb.mxu1 %v1987_v29  ;;  %v2366_v29 = vld [vmem:[#allocation8 + $0x74] sm:$0xf] }
  0x80   :  { %1089 = vmatpush.bf16.msrb.mxu2 %v2027_v40  ;;  %v2101_v32 = vor.u32 %v2366_v29, %v2098_v31  ;;  %v2362_v40 = vld [vmem:[#allocation8 + $0x54] sm:$0xf] }
  0x81   :  { %1047 = vmatpush.bf16.msrb.mxu3 %v1835_v33  ;;  %v2365_v33 = vld [vmem:[#allocation8 + $0x64] sm:$0xf0] }
  0x82   :  { %1059 = vmatpush.bf16.msrb.mxu0 %v1915_v41  ;;  %v2082_v41 = vld [vmem:[#allocation8 + $0x58] sm:$0xf0] }
  0x83   :  { %1073 = vmatpush.bf16.msrb.mxu1 %v1979_v44  ;;  %v2085_v44 = vor.u32 %v2362_v40, %v2082_v41  ;;  %v2382_v40 = vld [vmem:[#allocation8 + $0xf4] sm:$0xf] }
  0x84   :  { %1090 = vmatpush.bf16.msrb.mxu2 %v2019_v53  ;;  %v2065_v53 = vor.u32 %v2359_v51, %v2064_v12  ;;  %v2381_v12 = vld [vmem:[#allocation8 + $0xe4] sm:$0xf0]  ;;  %v2380_v51 = vld [vmem:[#allocation8 + $0xe4] sm:$0xf] }
  0x85   :  { %1048 = vmatpush.bf16.msrb.mxu3 %v1827_v48  ;;  %v2073_v48 = vor.u32 %v2361_v46, %v2072_v45 }
  0x86   :  { %1060 = vmatpush.bf16.msrb.mxu0 %v1907_v54  ;;  %v2066_v54 = vld [vmem:[#allocation8 + $0x38] sm:$0xf0] }
  0x87   :  { %1074 = vmatpush.bf16.msrb.mxu1 %v1971_v55  ;;  %v2069_v55 = vor.u32 %v2358_v52, %v2066_v54 }
  0x88   :  { %1091 = vmatpush.bf16.msrb.mxu2 %v2011_v0  ;;  %v2355_v0 = vld [vmem:[#allocation8 + $0x14] sm:$0xf0] }
  0x89   :  { %1049 = vmatpush.bf16.msrb.mxu3 %v1819_v59  ;;  %v2057_v59 = vor.u32 %v2357_v57, %v2056_v56 }
  0x8a   :  { %1061 = vmatpush.bf16.msrb.mxu0 %v1899_v1  ;;  %v2354_v1 = vld [vmem:[#allocation8 + $0x14] sm:$0xf] }
  0x8b   :  { %1075 = vmatpush.bf16.msrb.mxu1 %v1963_v2  ;;  %v2049_v2 = vor.u32 %v2355_v0, %v2048_v63  ;;  %v2136_v0 = vld [vmem:[#allocation8 + $0xc0] sm:$0xf] }
  0x8c   :  { %1092 = vmatpush.bf16.msrb.mxu2 %v2003_v14  ;;  %v252_v14 = vperm.slane %v2672_v5, 0 }
  0x8d   :  { %1050 = vmatpush.bf16.msrb.mxu3 %v1811_v8  ;;  %v2053_v8 = vor.u32 %v2354_v1, %v2050_v4  ;;  %v2377_v1 = vld [vmem:[#allocation8 + $0xc4] sm:$0xf0] }
  0x8e   :  { %1062 = vmatpush.bf16.msrb.mxu0 %v1891_v15  ;;  %v2041_v15 = vor.u32 %v2353_v11, %v2040_v10  ;;  %v2137_v4 = vor.u32 %v2377_v1, %v2136_v0  ;;  %v2128_v10 = vld [vmem:[#allocation8 + $0xb0] sm:$0xf]  ;;  %v2375_v11 = vld [vmem:[#allocation8 + $0xb4] sm:$0xf0] }
  0x8f   :  { %1076 = vmatpush.bf16.msrb.mxu1 %v1955_v16  ;;  %2037 = vmatmul.msk.bf16.vlgmr.msrb.gmra.mxu2 %vm864_vm1, %v2649_v3  ;;  %v2088_v3 = vld [vmem:[#allocation8 + $0x60] sm:$0xf]  ;;  %v2042_v16 = vld [vmem:[#allocation8 + $0x8] sm:$0xf0] }
  0x90   :  { %1051 = vmatmul.bf16.vlgmr.msrb.gmra.mxu3 %v2653_v38  ;;  %v2096_v38 = vld [vmem:[#allocation8 + $0x70] sm:$0xf]  ;;  %v2089_v35 = vor.u32 %v2365_v33, %v2088_v3  ;;  %v2045_v6 = vor.u32 %v2352_v13, %v2042_v16  ;;  %v2374_v13 = vld [vmem:[#allocation8 + $0xb4] sm:$0xf] }
  0x91   :  { %v2097_v30 = vor.u32 %v2367_v28, %v2096_v38 }
  0x92   :  { %1063 = vmatpush.bf16.msrb.mxu0 %v1883_v20 }
  0x93   :  { %1077 = vmatpush.bf16.msrb.mxu1 %v1947_v21  ;;  %1303 = vmatpush.bf16.msra.mxu2 %v2097_v30 }
  0x96   :  { %1064 = vmatpush.bf16.msrb.mxu0 %v1875_v26 }
  0x97   :  { %1078 = vmatpush.bf16.msrb.mxu1 %v1939_v27  ;;  %1304 = vmatpush.bf16.msra.mxu2 %v2089_v35 }
  0x99   :  { %1065 = vmatmul.bf16.vlgmr.msrb.gmra.mxu0 %v2657_v43  ;;  %v2363_v43 = vld [vmem:[#allocation8 + $0x54] sm:$0xf0] }
  0x9a   :  { %1079 = vmatmul.bf16.vlgmr.msrb.gmra.mxu1 %v2655_v42  ;;  %1331 = vmatpush.bf16.msra.mxu0 %v2101_v32  ;;  %v2081_v42 = vor.u32 %v2363_v43, %v2080_v39  ;;  %v2160_v39 = vld [vmem:[#allocation8 + $0xf0] sm:$0xf]  ;;  %v2383_v43 = vld [vmem:[#allocation8 + $0xf4] sm:$0xf0] }
  0x9b   :  { %v2161_v41 = vor.u32 %v2383_v43, %v2160_v39 }
  0x9c   :  { %1305 = vmatpush.bf16.msra.mxu2 %v2081_v42 }
  0x9d   :  { %1317 = vmatpush.bf16.msra.mxu3 %v2161_v41 }
  0x9e   :  { %1332 = vmatpush.bf16.msra.mxu0 %v2093_v37 }
  0xa0   :  { %1306 = vmatpush.bf16.msra.mxu2 %v2073_v48 }
  0xa2   :  { %1333 = vmatpush.bf16.msra.mxu0 %v2085_v44  ;;  %v2162_v44 = vld [vmem:[#allocation8 + $0xf8] sm:$0xf0] }
  0xa3   :  { %v2165_v47 = vor.u32 %v2382_v40, %v2162_v44 }
  0xa4   :  { %1307 = vmatpush.bf16.msra.mxu2 %v2065_v53  ;;  %v2154_v53 = vld [vmem:[#allocation8 + $0xe8] sm:$0xf0] }
  0xa5   :  { %1345 = vmatpush.bf16.msra.mxu1 %v2165_v47 }
  0xa6   :  { %1334 = vmatpush.bf16.msra.mxu0 %v2077_v50  ;;  %v2152_v50 = vld [vmem:[#allocation8 + $0xe0] sm:$0xf] }
  0xa7   :  { %v2153_v52 = vor.u32 %v2381_v12, %v2152_v50 }
  0xa8   :  { %1308 = vmatpush.bf16.msra.mxu2 %v2057_v59  ;;  %v2379_v59 = vld [vmem:[#allocation8 + $0xd4] sm:$0xf0] }
  0xa9   :  { %1318 = vmatpush.bf16.msra.mxu3 %v2153_v52 }
  0xaa   :  { %1335 = vmatpush.bf16.msra.mxu0 %v2069_v55  ;;  %v2157_v55 = vor.u32 %v2380_v51, %v2154_v53 }
  0xac   :  { %1309 = vmatpush.bf16.msra.mxu2 %v2049_v2  ;;  %1346 = vmatpush.bf16.msra.mxu1 %v2157_v55  ;;  %v2376_v2 = vld [vmem:[#allocation8 + $0xc4] sm:$0xf] }
  0xae   :  { %1336 = vmatpush.bf16.msra.mxu0 %v2061_v61 }
  0xb0   :  { %1310 = vmatpush.bf16.msra.mxu2 %v2041_v15  ;;  %v2130_v15 = vld [vmem:[#allocation8 + $0xb8] sm:$0xf0] }
  0xb1   :  { %v2133_v16 = vor.u32 %v2374_v13, %v2130_v15  ;;  %v2396_v13 = vld [vmem:[#allocation10 + $0x60] sm:$0xff] }
  0xb2   :  { %1337 = vmatpush.bf16.msra.mxu0 %v2053_v8  ;;  %v2138_v8 = vld [vmem:[#allocation8 + $0xc8] sm:$0xf0]  ;;  %v2388_v15 = vld [vmem:[#allocation10 + $0x20] sm:$0xff] }
  0xb6   :  { %v884_v7 = vpop.f32.mrf.mxu0  ;;  %1338 = vmatpush.bf16.msra.mxu0 %v2045_v6  ;;  %v2373_v6 = vld [vmem:[#allocation8 + $0xa4] sm:$0xf0] }
  0xb7   :  { %v898_v62 = vpop.f32.mrf.mxu1  ;;  %v885_v18 = vadd.f32 %v884_v7, %v252_v14  ;;  %v2145_v7 = vor.u32 %v2379_v59, %v2144_v58 }
  0xb9   :  { %v899_v21 = vadd.f32 %v898_v62, %v885_v18  ;;  %v2146_v62 = vld [vmem:[#allocation8 + $0xd8] sm:$0xf0]  ;;  %1319 = vmatpush.bf16.msra.mxu3 %v2145_v7  ;;  %v2372_v18 = vld [vmem:[#allocation8 + $0xa4] sm:$0xf] }
  0xba   :  { %v2149_v63 = vor.u32 %v2378_v60, %v2146_v62 }
  0xbc   :  { %1347 = vmatpush.bf16.msra.mxu1 %v2149_v63 }
  0xbd   :  { %1320 = vmatpush.bf16.msra.mxu3 %v2137_v4  ;;  %v2391_v4 = vld [vmem:[#allocation10 + $0x38] sm:$0xff] }
  0xbe   :  { %v912_v17 = vpop.f32.mrf.mxu2  ;;  %v886_v19 = vpop.f32.mrf.mxu0  ;;  %1497 = vmatpush.bf16.msrb.mxu2 %v2391_v4 }
  0xbf   :  { %v926_v9 = vpop.f32.mrf.mxu3  ;;  %v900_v20 = vpop.f32.mrf.mxu1  ;;  %v887_v22 = vadd.f32 %v886_v19, %v252_v14  ;;  %v913_v25 = vadd.f32 %v912_v17, %v899_v21  ;;  %v2129_v14 = vor.u32 %v2375_v11, %v2128_v10  ;;  %v2120_v17 = vld [vmem:[#allocation8 + $0xa0] sm:$0xf]  ;;  %v2397_v10 = vld [vmem:[#allocation10 + $0x68] sm:$0xff] }
  0xc0   :  { %v2121_v19 = vor.u32 %v2373_v6, %v2120_v17  ;;  %v2389_v11 = vld [vmem:[#allocation10 + $0x28] sm:$0xff]  ;;  %v2387_v17 = vld [vmem:[#allocation10 + $0x18] sm:$0xff] }
  0xc1   :  { %v901_v26 = vadd.f32 %v900_v20, %v887_v22  ;;  %v927_v28 = vadd.f32 %v926_v9, %v913_v25  ;;  %v2141_v9 = vor.u32 %v2376_v2, %v2138_v8  ;;  %1321 = vmatpush.bf16.msra.mxu3 %v2129_v14  ;;  %v2122_v20 = vld [vmem:[#allocation8 + $0xa8] sm:$0xf0]  ;;  %v2370_v25 = vld [vmem:[#allocation8 + $0x94] sm:$0xf]  ;;  %v2399_v2 = vld [vmem:[#allocation10 + $0x78] sm:$0xff] }
  0xc2   :  { %v2125_v21 = vor.u32 %v2372_v18, %v2122_v20  ;;  %v2398_v8 = vld [vmem:[#allocation10 + $0x70] sm:$0xff]  ;;  %v2395_v14 = vld [vmem:[#allocation10 + $0x58] sm:$0xff]  ;;  %v2393_v6 = vld [vmem:[#allocation10 + $0x48] sm:$0xff] }
  0xc3   :  { %1348 = vmatpush.bf16.msra.mxu1 %v2141_v9  ;;  %v2390_v9 = vld [vmem:[#allocation10 + $0x30] sm:$0xff]  ;;  %v2385_v20 = vld [vmem:[#allocation10 + $0x8] sm:$0xff] }
  0xc4   :  { %1498 = vmatpush.bf16.msrb.mxu2 %v2390_v9  ;;  %v2386_v18 = vld [vmem:[#allocation10 + $0x10] sm:$0xff] }
  0xc5   :  { %1322 = vmatpush.bf16.msra.mxu3 %v2121_v19  ;;  %v2392_v19 = vld [vmem:[#allocation10 + $0x40] sm:$0xff] }
  0xc6   :  { %v914_v24 = vpop.f32.mrf.mxu2 }
  0xc7   :  { %v928_v23 = vpop.f32.mrf.mxu3  ;;  %v915_v29 = vadd.f32 %v914_v24, %v901_v26  ;;  %1349 = vmatpush.bf16.msra.mxu1 %v2133_v16  ;;  %v2371_v24 = vld [vmem:[#allocation8 + $0x94] sm:$0xf0]  ;;  %v2394_v16 = vld [vmem:[#allocation10 + $0x50] sm:$0xff] }
  0xc8   :  { %1499 = vmatpush.bf16.msrb.mxu2 %v2389_v11 }
  0xc9   :  { %v929_v3 = vadd.f32 %v928_v23, %v915_v29  ;;  %v2112_v23 = vld [vmem:[#allocation8 + $0x90] sm:$0xf] }
  0xca   :  { %v2113_v26 = vor.u32 %v2371_v24, %v2112_v23  ;;  %v1137_v23 = vld [vmem:[%s2692_s4] sm:$0x3] }
  0xcb   :  { %1350 = vmatpush.bf16.msra.mxu1 %v2125_v21  ;;  %v2384_v21 = vld [vmem:[#allocation10] sm:$0xff] }
  0xcc   :  { %1323 = vmatpush.bf16.msra.mxu3 %v2113_v26  ;;  %1500 = vmatpush.bf16.msrb.mxu2 %v2388_v15  ;;  %v1140_v26 = vperm.slane %v1137_v23, 1 }
  0xd0   :  { %1501 = vmatpush.bf16.msrb.mxu2 %v2387_v17 }
  0xd3   :  { %v982_v30 = vpop.f32.mrf.mxu3 }
  0xd4   :  { %1502 = vmatpush.bf16.msrb.mxu2 %v2386_v18 }
  0xd6   :  { %v940_v27 = vpop.f32.mrf.mxu0 }
  0xd7   :  { %v954_v38 = vpop.f32.mrf.mxu1  ;;  %v941_v31 = vadd.f32 %v940_v27, %v927_v28  ;;  %v2114_v27 = vld [vmem:[#allocation8 + $0x98] sm:$0xf0] }
  0xd8   :  { %1503 = vmatpush.bf16.msrb.mxu2 %v2385_v20 }
  0xd9   :  { %v955_v34 = vadd.f32 %v954_v38, %v941_v31  ;;  %v2117_v38 = vor.u32 %v2370_v25, %v2114_v27  ;;  %v2369_v31 = vld [vmem:[#allocation8 + $0x84] sm:$0xf0] }
  0xdb   :  { %v984_v46 = vpop.f32.mrf.mxu3  ;;  %1351 = vmatpush.bf16.msra.mxu1 %v2117_v38 }
  0xdc   :  { %1504 = vmatpush.bf16.msrb.mxu2 %v2384_v21 }
  0xde   :  { %v968_v32 = vpop.f32.mrf.mxu2  ;;  %v942_v33 = vpop.f32.mrf.mxu0 }
  0xdf   :  { %v943_v35 = vadd.f32 %v942_v33, %v929_v3  ;;  %v956_v36 = vpop.f32.mrf.mxu1  ;;  %v969_v37 = vadd.f32 %v968_v32, %v955_v34  ;;  %v2368_v32 = vld [vmem:[#allocation8 + $0x84] sm:$0xf]  ;;  %v253_v3 = vperm.slane %v2672_v5, 1 }
  0xe1   :  { %v957_v42 = vadd.f32 %v956_v36, %v943_v35  ;;  %v983_v48 = vadd.f32 %v982_v30, %v969_v37  ;;  %v2104_v30 = vld [vmem:[#allocation8 + $0x80] sm:$0xf]  ;;  %v2106_v35 = vld [vmem:[#allocation8 + $0x88] sm:$0xf0] }
  0xe2   :  { %v2105_v34 = vor.u32 %v2369_v31, %v2104_v30  ;;  %v2109_v36 = vor.u32 %v2368_v32, %v2106_v35 }
  0xe3   :  { %v1099_v56 = vmax.f32 %v983_v48, 0.0 }
  0xe4   :  { %1324 = vmatpush.bf16.msra.mxu3 %v2105_v34  ;;  %1352 = vmatpush.bf16.msra.mxu1 %v2109_v36 }
  0xe6   :  { %v970_v45 = vpop.f32.mrf.mxu2 }
  0xe7   :  { %v971_v49 = vadd.f32 %v970_v45, %v957_v42 }
  0xe8   :  { %1511 = vmatpush.bf16.msrb.mxu3 %v2399_v2 }
  0xe9   :  { %v985_v54 = vadd.f32 %v984_v46, %v971_v49 }
  0xeb   :  { %v1101_v57 = vmax.f32 %v985_v54, 0.0 }
  0xec   :  { %1512 = vmatpush.bf16.msrb.mxu3 %v2398_v8 }
  0xed   :  { %v1103_v61 = vpack.c.bf16 %v1101_v57, %v1099_v56 }
  0xef   :  { %1311 = vmatmul.bf16.vlgmr.msra.gmra.mxu2 %v1103_v61  ;;  %1339 = vmatmul.bf16.vlgmr.msra.gmra.mxu0 %v1103_v61 }
  0xf0   :  { %1513 = vmatpush.bf16.msrb.mxu3 %v2397_v10 }
  0xf3   :  { %v996_v22 = vpop.f32.mrf.mxu3 }
  0xf4   :  { %v997_v37 = vadd.f32 %v996_v22, %v253_v3  ;;  %1514 = vmatpush.bf16.msrb.mxu3 %v2396_v13 }
  0xf6   :  { %v1010_v28 = vpop.f32.mrf.mxu0 }
  0xf7   :  { %v1024_v33 = vpop.f32.mrf.mxu1  ;;  %v1011_v43 = vadd.f32 %v1010_v28, %v997_v37 }
  0xf8   :  { %1515 = vmatpush.bf16.msrb.mxu3 %v2395_v14 }
  0xf9   :  { %v1025_v45 = vadd.f32 %v1024_v33, %v1011_v43 }
  0xfb   :  { %v998_v39 = vpop.f32.mrf.mxu3 }
  0xfc   :  { %v999_v41 = vadd.f32 %v998_v39, %v253_v3  ;;  %1516 = vmatpush.bf16.msrb.mxu3 %v2394_v16 }
  0xfe   :  { %v1038_v29 = vpop.f32.mrf.mxu2  ;;  %v1012_v40 = vpop.f32.mrf.mxu0 }
  0xff   :  { %v1026_v44 = vpop.f32.mrf.mxu1  ;;  %v1013_v47 = vadd.f32 %v1012_v40, %v999_v41  ;;  %v1039_v48 = vadd.f32 %v1038_v29, %v1025_v45  ;;  %v1139_v29 = vperm.slane %v1137_v23, 0 }
 0x100   :  { %1517 = vmatpush.bf16.msrb.mxu3 %v2393_v6 }
 0x101   :  { %v1027_v50 = vadd.f32 %v1026_v44, %v1013_v47 }
 0x104   :  { %1518 = vmatpush.bf16.msrb.mxu3 %v2392_v19 }
 0x106   :  { %v1040_v42 = vpop.f32.mrf.mxu2 }
 0x107   :  { %v1041_v54 = vadd.f32 %v1040_v42, %v1027_v50 }
 0x112   :  { %v1094_v51 = vpop.f32.mrf.mxu2 }
 0x113   :  { %v1052_v46 = vpop.f32.mrf.mxu3 }
 0x114   :  { %v1053_v5 = vadd.f32 %v1052_v46, %v1039_v48  ;;  %v2411_v46 = vld [vmem:[%s2694_s6] ss:$0 sm:$0xff] }
 0x116   :  { %v1066_v49 = vpop.f32.mrf.mxu0 }
 0x117   :  { %v1080_v12 = vpop.f32.mrf.mxu1  ;;  %v1067_v52 = vadd.f32 %v1066_v49, %v1053_v5 }
 0x119   :  { %v1081_v55 = vadd.f32 %v1080_v12, %v1067_v52 }
 0x11a   :  { %v1096_v7 = vpop.f32.mrf.mxu2 }
 0x11b   :  { %v1054_v53 = vpop.f32.mrf.mxu3  ;;  %v1095_v60 = vadd.f32 %v1094_v51, %v1081_v55 }
 0x11c   :  { %v1055_v56 = vadd.f32 %v1054_v53, %v1041_v54 }
 0x11d   :  { %v1100_v63 = vmax.f32 %v1095_v60, 0.0 }
 0x11e   :  { %v1068_v57 = vpop.f32.mrf.mxu0 }
 0x11f   :  { %v1069_v58 = vadd.f32 %v1068_v57, %v1055_v56  ;;  %v1082_v59 = vpop.f32.mrf.mxu1 }
 0x121   :  { %v1083_v61 = vadd.f32 %v1082_v59, %v1069_v58 }
 0x123   :  { %v1097_v62 = vadd.f32 %v1096_v7, %v1083_v61 }
 0x125   :  { %v1102_v0 = vmax.f32 %v1097_v62, 0.0 }
 0x127   :  { %v1104_v1 = vpack.c.bf16 %v1102_v0, %v1100_v63 }
 0x129   :  { %1325 = vmatmul.bf16.vlgmr.msra.gmra.mxu3 %v1104_v1  ;;  %1353 = vmatmul.bf16.vlgmr.msra.gmra.mxu1 %v1104_v1 }
 0x16c   :  { %v1340_v22 = vpop.f32.mrf.mxu0 }
 0x16d   :  { %v1341_v38 = vadd.f32 %v1340_v22, %v1140_v26 }
 0x172   :  { %v1312_v24 = vpop.f32.mrf.mxu2 }
 0x173   :  { %v1313_v34 = vadd.f32 %v1312_v24, %v1139_v29 }
 0x174   :  { %v1342_v27 = vpop.f32.mrf.mxu0 }
 0x175   :  { %v1343_v30 = vadd.f32 %v1342_v27, %v1140_v26 }
 0x17a   :  { %v1314_v33 = vpop.f32.mrf.mxu2 }
 0x17b   :  { %v1315_v37 = vadd.f32 %v1314_v33, %v1139_v29 }
 0x1a6   :  { %v1354_v25 = vpop.f32.mrf.mxu1 }
 0x1a7   :  { %v1355_v31 = vadd.f32 %v1354_v25, %v1341_v38 }
 0x1a9   :  { %v1360_v35 = vmax.f32 %v1355_v31, 0.0 }
 0x1ac   :  { %v1326_v28 = vpop.f32.mrf.mxu3 }
 0x1ad   :  { %v1327_v39 = vadd.f32 %v1326_v28, %v1313_v34 }
 0x1ae   :  { %v1356_v32 = vpop.f32.mrf.mxu1 }
 0x1af   :  { %v1357_v3 = vadd.f32 %v1356_v32, %v1343_v30  ;;  %v1359_v41 = vmax.f32 %v1327_v39, 0.0 }
 0x1b1   :  { %v1362_v36 = vmax.f32 %v1357_v3, 0.0 }
 0x1b3   :  { %v1364_v43 = vpack.c.bf16 %v1362_v36, %v1360_v35 }
 0x1b4   :  { %v1328_v40 = vpop.f32.mrf.mxu3 }
 0x1b5   :  { %v1329_v42 = vadd.f32 %v1328_v40, %v1315_v37  ;;  %1519 = vmatmul.bf16.vlgmr.msrb.gmra.mxu3 %v1364_v43 }
 0x1b7   :  { %v1361_v44 = vmax.f32 %v1329_v42, 0.0 }
 0x1b9   :  { %v1363_v45 = vpack.c.bf16 %v1361_v44, %v1359_v41 }
 0x1bb   :  { %1505 = vmatmul.bf16.vlgmr.msrb.gmra.mxu2 %v1363_v45 }
 0x238   :  { %v1520_v47 = vpop.f32.mrf.mxu3 }
 0x23e   :  { %v1506_v48 = vpop.f32.mrf.mxu2 }
 0x23f   :  { %v1507_v49 = vadd.f32 %v2411_v46, %v1506_v48 }
 0x240   :  { %v1522_v51 = vpop.f32.mrf.mxu3 }
 0x241   :  { %v1521_v50 = vadd.f32 %v1520_v47, %v1507_v49 }
 0x243   :  { %1525 = vst [vmem:[#allocation11] sm:$0xff] %v1521_v50 }
 0x246   :  { %v1508_v5 = vpop.f32.mrf.mxu2 }
 0x247   :  { %v1509_v12 = vadd.f32 %v2411_v46, %v1508_v5 }
 0x249   :  { %v1523_v52 = vadd.f32 %v1522_v51, %v1509_v12 }
 0x24b   :  { %1526 = vst [vmem:[#allocation11 + $0x8] sm:$0xff] %v1523_v52 }
 0x24c   :  { %1539 = dma.vmem_to_hbm [thread:$0]  %s1532_s30, 256, %s1534_s12, [#allocation4], %s2565_s9, %s2565_s9, %s2566_s10  }
 0x24d   :  { %2562 = dma.done.wait [#allocation4], 256  }
 0x24e   :  { %2563 = vsyncadd [#allocation4], 4294967040 }
 0x24f   :  { %1544 = vsyncpa [#allocation3], 1 }
 0x250   :  { %1545 = vsyncpa [#allocation6], 1 }
 0x251   :  { %1546 = vsyncpa [#allocation9], 1 }
 0x252   :  { %1547 = vsyncpa [#allocation4], 1 }

</bundles_post_ra>
